<compile_context>
chip_gen: v7x
topology: tpu7x:2x2x1
jax: 0.10.0
libtpu: 0.0.40
codegen_flags: <defaults>
</compile_context>

<pallas_src>
import math

import jax
import jax.numpy as jnp
from jax import lax
from jax.experimental import pallas as pl
from jax.experimental.pallas import tpu as pltpu


# ---------------------------------------------------------------------------
# generation-specific VMEM budget
# ---------------------------------------------------------------------------
def _pick_vmem_limit():
    try:
        info = pltpu.get_tpu_info()
        cap = int(getattr(info, "vmem_capacity_bytes", 64 << 20))
    except Exception:
        cap = 64 << 20
    if cap >= (128 << 20):          # v5e / v6e: 128 MiB physical VMEM
        return 100 << 20
    return 48 << 20                 # v7x (64 MiB physical) or unknown


VMEM_LIMIT_BYTES = _pick_vmem_limit()
SCORE_BUDGET_BYTES = VMEM_LIMIT_BYTES // 6     # cap on the (TQ, Nk) fp32 score block


# ---------------------------------------------------------------------------
# small static helpers (trace-time only)
# ---------------------------------------------------------------------------
def _round_up(n, m):
    return ((n + m - 1) // m) * m


def _row_tiling(m, max_tile):
    """Return (tile, padded_m): tile is 8-aligned (or == padded_m) and divides padded_m."""
    m8 = _round_up(m, 8)
    if m8 <= max_tile:
        return m8, m8
    t = max(8, (max_tile // 8) * 8)
    return t, _round_up(m8, t)


def _divisor_tile(n, max_tile):
    """Largest 8-aligned divisor of n that is <= max_tile (or n itself if n is small)."""
    if n <= max_tile:
        return n
    for d in range(min(max_tile, n), 7, -1):
        if n % d == 0 and d % 8 == 0:
            return d
    return n  # TODO(synk): pad G for sizes with no 8-aligned divisor <= max_tile


# ---------------------------------------------------------------------------
# Kernel 1: fused 2-layer MLP, optionally adding its own input as residual
#   out = [x +] relu(x @ W1 + b1) @ W2 + b2
# Row-tiled over M, weights resident, bf16 matmul operands, fp32 accumulation.
# ---------------------------------------------------------------------------
def _make_mlp_kernel(add_input_residual):
    def kernel(x_ref, w1_ref, b1_ref, w2_ref, b2_ref, o_ref):
        x = x_ref[...]
        h = jnp.dot(x.astype(jnp.bfloat16), w1_ref[...],
                    preferred_element_type=jnp.float32) + b1_ref[...]
        h = jnp.maximum(h, 0.0)
        o = jnp.dot(h.astype(jnp.bfloat16), w2_ref[...],
                    preferred_element_type=jnp.float32) + b2_ref[...]
        if add_input_residual:
            o = o + x[:, :o.shape[1]].astype(jnp.float32)
        o_ref[...] = o.astype(o_ref.dtype)
    return kernel


def mlp_apply(x2d, params, *, residual_is_input=False, out_dtype=jnp.bfloat16,
              max_tile_m=8192):
    (w1, b1), (w2, b2) = params
    m, din = x2d.shape
    dh, dout = w1.shape[1], w2.shape[1]
    if residual_is_input:
        assert dout == din

    # pad the input-feature (lane) dim to a multiple of 8 for cleaner DMA
    din_p = _round_up(din, 8)
    if din_p != din:
        x2d = jnp.pad(x2d, ((0, 0), (0, din_p - din)))
        w1 = jnp.pad(w1, ((0, din_p - din), (0, 0)))

    tm, m_pad = _row_tiling(m, max_tile_m)
    if m_pad != m:
        x2d = jnp.pad(x2d, ((0, m_pad - m), (0, 0)))

    out = pl.pallas_call(
        _make_mlp_kernel(residual_is_input),
        out_shape=jax.ShapeDtypeStruct((m_pad, dout), out_dtype),
        grid=(m_pad // tm,),
        in_specs=[
            pl.BlockSpec((tm, din_p), lambda i: (i, 0)),
            pl.BlockSpec((din_p, dh), lambda i: (0, 0)),
            pl.BlockSpec((1, dh), lambda i: (0, 0)),
            pl.BlockSpec((dh, dout), lambda i: (0, 0)),
            pl.BlockSpec((1, dout), lambda i: (0, 0)),
        ],
        out_specs=pl.BlockSpec((tm, dout), lambda i: (i, 0)),
        compiler_params=pltpu.CompilerParams(
            dimension_semantics=("parallel",),
            vmem_limit_bytes=VMEM_LIMIT_BYTES),
    )(x2d, w1, b1, w2, b2)
    return out if m_pad == m else out[:m]


# ---------------------------------------------------------------------------
# Kernel 2: MultiModalGridEncoder, all modes fused in one kernel.
# Grid = (batch, G-tiles, modes); semantics ("parallel","arbitrary","arbitrary").
#   * per (batch, mode): xy_encoder MLP computed ONCE (under pl.when(j==0)) into
#     z_scr[m]; the extra constant-1 output column carries the per-cell count so the
#     mean-pool count rides in the same MXU matmul as the sum.
#   * per (batch, G-tile): one-hot nearest-cell pooling + per-mode projection,
#     accumulated in a VMEM-resident (tg, dz) accumulator across the mode axis;
#     the (B, G, dz) output is written exactly once (bf16, lane-dense per tile).
# ---------------------------------------------------------------------------
def _grid_encode_kernel(idx_ref, xy_ref, w1_ref, b1_ref, w2a_ref, b2a_ref,
                        wm_ref, bm_ref, o_ref, z_scr, acc_scr):
    j = pl.program_id(1)
    m = pl.program_id(2)
    tg = o_ref.shape[1]
    ncp = idx_ref.shape[-1]
    dz = wm_ref.shape[2]

    # hoisted xy_encoder MLP: once per (batch, mode), reused for every grid tile
    @pl.when(j == 0)
    def _():
        xy = xy_ref[0, 0].astype(jnp.bfloat16)                       # (NCP, DIN_P)
        h = jnp.dot(xy, w1_ref[0], preferred_element_type=jnp.float32) + b1_ref[0]
        h = jnp.maximum(h, 0.0)
        z_scr[m] = jnp.dot(h.astype(jnp.bfloat16), w2a_ref[0],
                           preferred_element_type=jnp.float32) + b2a_ref[0]

    @pl.when(m == 0)
    def _():
        acc_scr[...] = jnp.zeros_like(acc_scr)

    # nearest-cell one-hot pooling for this G-tile (MXU matmul; count in last column)
    idx = idx_ref[0, 0]                                               # (1, NCP) int32
    rows = lax.broadcasted_iota(jnp.int32, (tg, ncp), 0) + j * tg
    onehot = (rows == idx).astype(jnp.bfloat16)                       # (tg, NCP)
    pooled = jnp.dot(onehot, z_scr[m].astype(jnp.bfloat16),
                     preferred_element_type=jnp.float32)              # (tg, dz+1)
    mean = pooled[:, :dz] / jnp.maximum(pooled[:, dz:], 1.0)          # exact count div

    proj = jnp.dot(mean.astype(jnp.bfloat16), wm_ref[0],
                   preferred_element_type=jnp.float32) + bm_ref[0]
    acc_scr[...] += proj

    @pl.when(m == pl.num_programs(2) - 1)
    def _():
        o_ref[0] = acc_scr[...].astype(o_ref.dtype)


def nearest_cell_idx(x, points_per_dim):
    """x: (B, N, dx) coordinates in [-1, 1] -> flat nearest-lattice-point index."""
    idx = jnp.clip(
        jnp.round((x + 1.0) * 0.5 * (points_per_dim - 1)), 0, points_per_dim - 1
    ).astype(jnp.int32)
    dx = x.shape[-1]
    flat = jnp.zeros(x.shape[:-1], jnp.int32)
    for d in range(dx):
        flat = flat * points_per_dim + idx[..., d]
    return flat


def grid_encode(xc, yc, xy_params, proj_params, mode_names, points_per_dim, dz,
                *, out_dtype=jnp.bfloat16, max_tile_g=2048):
    modes = list(mode_names)
    nm = len(modes)
    b = xc[modes[0]].shape[0]
    dx = xc[modes[0]].shape[-1]
    num_cells = points_per_dim ** dx
    din = dx + yc[modes[0]].shape[-1]
    din_p = _round_up(din, 8)
    ncp = _round_up(max(xc[mod].shape[1] for mod in modes), 8)

    xy_l, idx_l, w1_l, b1_l, w2a_l, b2a_l, wm_l, bm_l = ([] for _ in range(8))
    for mod in modes:
        nc = xc[mod].shape[1]
        xy = jnp.concatenate([xc[mod], yc[mod]], axis=-1)
        xy = jnp.pad(xy, ((0, 0), (0, ncp - nc), (0, din_p - din)))
        idx = nearest_cell_idx(xc[mod], points_per_dim)
        idx = jnp.pad(idx, ((0, 0), (0, ncp - nc)), constant_values=-1)  # never matches
        (w1, b1), (w2, b2) = xy_params[mod]
        wm, bm = proj_params[mod]
        dh = w1.shape[1]
        w1 = jnp.pad(w1, ((0, din_p - din), (0, 0)))
        # augmented second layer: last output column is exactly 1 -> per-cell count
        w2a = jnp.concatenate([w2, jnp.zeros((dh, 1), w2.dtype)], axis=1)
        b2a = jnp.concatenate([b2, jnp.ones((1, 1), b2.dtype)], axis=1)
        xy_l.append(xy)
        idx_l.append(idx[:, None, :])
        w1_l.append(w1); b1_l.append(b1); w2a_l.append(w2a); b2a_l.append(b2a)
        wm_l.append(wm); bm_l.append(bm)

    xy_s = jnp.stack(xy_l)            # (M, B, NCP, DIN_P)
    idx_s = jnp.stack(idx_l)          # (M, B, 1, NCP)
    w1_s = jnp.stack(w1_l)            # (M, DIN_P, dh)    bf16
    b1_s = jnp.stack(b1_l)            # (M, 1, dh)
    w2a_s = jnp.stack(w2a_l)          # (M, dh, dz+1)     bf16
    b2a_s = jnp.stack(b2a_l)          # (M, 1, dz+1)
    wm_s = jnp.stack(wm_l)            # (M, dz, dz)       bf16
    bm_s = jnp.stack(bm_l)            # (M, 1, dz)
    dh = w1_s.shape[-1]

    # keep the (tg, NCP) one-hot block well under the VMEM budget
    cap = max(8, min(max_tile_g, (VMEM_LIMIT_BYTES // 8) // max(ncp * 4, 1) // 8 * 8))
    tg = _divisor_tile(num_cells, cap)
    # TODO(synk): for context sets with Nc in the tens of thousands, additionally tile
    # the Nc axis (accumulating the pooled sums) to keep z_scr / onehot within VMEM.

    return pl.pallas_call(
        _grid_encode_kernel,
        out_shape=jax.ShapeDtypeStruct((b, num_cells, dz), out_dtype),
        grid=(b, num_cells // tg, nm),
        in_specs=[
            pl.BlockSpec((1, 1, 1, ncp), lambda i, j, m: (m, i, 0, 0)),
            pl.BlockSpec((1, 1, ncp, din_p), lambda i, j, m: (m, i, 0, 0)),
            pl.BlockSpec((1, din_p, dh), lambda i, j, m: (m, 0, 0)),
            pl.BlockSpec((1, 1, dh), lambda i, j, m: (m, 0, 0)),
            pl.BlockSpec((1, dh, dz + 1), lambda i, j, m: (m, 0, 0)),
            pl.BlockSpec((1, 1, dz + 1), lambda i, j, m: (m, 0, 0)),
            pl.BlockSpec((1, dz, dz), lambda i, j, m: (m, 0, 0)),
            pl.BlockSpec((1, 1, dz), lambda i, j, m: (m, 0, 0)),
        ],
        out_specs=pl.BlockSpec((1, tg, dz), lambda i, j, m: (i, j, 0)),
        scratch_shapes=[pltpu.VMEM((nm, ncp, dz + 1), jnp.float32),
                        pltpu.VMEM((tg, dz), jnp.float32)],
        compiler_params=pltpu.CompilerParams(
            dimension_semantics=("parallel", "arbitrary", "arbitrary"),
            vmem_limit_bytes=VMEM_LIMIT_BYTES),
    )(idx_s, xy_s, w1_s, b1_s, w2a_s, b2a_s, wm_s, bm_s)


# ---------------------------------------------------------------------------
# Kernel 3a: self-attention over grid tokens with fused residual.
# QKV projected ONCE per batch into VMEM scratch (one (dz, 3*dz) matmul, scale folded
# into Wq); per q-tile only scores/softmax/AV/Wo run.  Grid = (batch, q-tiles).
# ---------------------------------------------------------------------------
def _self_attn_kernel(x_ref, xseq_ref, wqkv_ref, wo_ref, o_ref, qkv_scr):
    j = pl.program_id(1)
    dz = wo_ref.shape[0]
    tq = x_ref.shape[1]

    @pl.when(j == 0)
    def _():
        qkv_scr[...] = jnp.dot(xseq_ref[0].astype(jnp.bfloat16), wqkv_ref[...],
                               preferred_element_type=jnp.float32)

    row0 = j * tq
    if tq % 8 == 0:
        row0 = pl.multiple_of(row0, 8)
    q = qkv_scr[pl.ds(row0, tq), :][:, :dz]          # 1/sqrt(dz) already in Wq
    kv = qkv_scr[...]
    k = kv[:, dz:2 * dz]
    v = kv[:, 2 * dz:]
    s = lax.dot_general(q.astype(jnp.bfloat16), k.astype(jnp.bfloat16),
                        (((1,), (1,)), ((), ())),
                        preferred_element_type=jnp.float32)          # (tq, n)
    s = s - jnp.max(s, axis=-1, keepdims=True)
    p = jnp.exp(s)
    p = p * pl.reciprocal(jnp.sum(p, axis=-1, keepdims=True), approx=True)
    att = jnp.dot(p.astype(jnp.bfloat16), v.astype(jnp.bfloat16),
                  preferred_element_type=jnp.float32)
    out = jnp.dot(att.astype(jnp.bfloat16), wo_ref[...],
                  preferred_element_type=jnp.float32)
    o_ref[0] = (x_ref[0].astype(jnp.float32) + out).astype(o_ref.dtype)


def self_attn_apply(x, params, *, out_dtype=jnp.bfloat16, max_tile_q=1024):
    wq, wk, wv, wo = params
    b, n, dz = x.shape
    scale = 1.0 / math.sqrt(dz)
    wqkv = jnp.concatenate(
        [(wq.astype(jnp.float32) * scale).astype(jnp.bfloat16), wk, wv], axis=1)
    cap = max(8, min(max_tile_q, (SCORE_BUDGET_BYTES // max(n * 4, 1)) // 8 * 8))
    tq = _divisor_tile(n, cap)
    # TODO(synk): for extremely large grids (n >> 10k) switch to flash-style Nk tiling
    # with online-softmax scratch instead of the full-sequence QKV scratch below.
    return pl.pallas_call(
        _self_attn_kernel,
        out_shape=jax.ShapeDtypeStruct((b, n, dz), out_dtype),
        grid=(b, n // tq),
        in_specs=[
            pl.BlockSpec((1, tq, dz), lambda i, j: (i, j, 0)),   # residual tile
            pl.BlockSpec((1, n, dz), lambda i, j: (i, 0, 0)),    # full seq for QKV once
            pl.BlockSpec((dz, 3 * dz), lambda i, j: (0, 0)),
            pl.BlockSpec((dz, dz), lambda i, j: (0, 0)),
        ],
        out_specs=pl.BlockSpec((1, tq, dz), lambda i, j: (i, j, 0)),
        scratch_shapes=[pltpu.VMEM((n, 3 * dz), jnp.float32)],
        compiler_params=pltpu.CompilerParams(
            dimension_semantics=("parallel", "arbitrary"),
            vmem_limit_bytes=VMEM_LIMIT_BYTES),
    )(x, x, wqkv, wo)


# ---------------------------------------------------------------------------
# Kernel 3b: cross-attention targets -> grid with fused residual.
# K/V projected ONCE per batch into VMEM scratch (fused (dz, 2*dz) matmul); Q projected
# per (small) target tile; scale folded into Wq.
# ---------------------------------------------------------------------------
def _cross_attn_kernel(xq_ref, xkv_ref, wq_ref, wkv_ref, wo_ref, o_ref, kv_scr):
    j = pl.program_id(1)
    dz = wq_ref.shape[0]

    @pl.when(j == 0)
    def _():
        kv_scr[...] = jnp.dot(xkv_ref[0].astype(jnp.bfloat16), wkv_ref[...],
                              preferred_element_type=jnp.float32)

    xq = xq_ref[0]
    q = jnp.dot(xq.astype(jnp.bfloat16), wq_ref[...],
                preferred_element_type=jnp.float32)                  # scale in Wq
    kv = kv_scr[...]
    k = kv[:, :dz]
    v = kv[:, dz:]
    s = lax.dot_general(q.astype(jnp.bfloat16), k.astype(jnp.bfloat16),
                        (((1,), (1,)), ((), ())),
                        preferred_element_type=jnp.float32)
    s = s - jnp.max(s, axis=-1, keepdims=True)
    p = jnp.exp(s)
    p = p * pl.reciprocal(jnp.sum(p, axis=-1, keepdims=True), approx=True)
    att = jnp.dot(p.astype(jnp.bfloat16), v.astype(jnp.bfloat16),
                  preferred_element_type=jnp.float32)
    out = jnp.dot(att.astype(jnp.bfloat16), wo_ref[...],
                  preferred_element_type=jnp.float32)
    o_ref[0] = (xq.astype(jnp.float32) + out).astype(o_ref.dtype)


def cross_attn_apply(xq, xkv, params, *, out_dtype=jnp.bfloat16, max_tile_q=1024):
    wq, wk, wv, wo = params
    b, nq, dz = xq.shape
    nk = xkv.shape[1]
    scale = 1.0 / math.sqrt(dz)
    wq_s = (wq.astype(jnp.float32) * scale).astype(jnp.bfloat16)
    wkv = jnp.concatenate([wk, wv], axis=1)
    cap = max(8, min(max_tile_q, (SCORE_BUDGET_BYTES // max(nk * 4, 1)) // 8 * 8))
    tq, nq_pad = _row_tiling(nq, cap)
    xq_p = xq if nq_pad == nq else jnp.pad(xq, ((0, 0), (0, nq_pad - nq), (0, 0)))
    out = pl.pallas_call(
        _cross_attn_kernel,
        out_shape=jax.ShapeDtypeStruct((b, nq_pad, dz), out_dtype),
        grid=(b, nq_pad // tq),
        in_specs=[
            pl.BlockSpec((1, tq, dz), lambda i, j: (i, j, 0)),
            pl.BlockSpec((1, nk, dz), lambda i, j: (i, 0, 0)),
            pl.BlockSpec((dz, dz), lambda i, j: (0, 0)),
            pl.BlockSpec((dz, 2 * dz), lambda i, j: (0, 0)),
            pl.BlockSpec((dz, dz), lambda i, j: (0, 0)),
        ],
        out_specs=pl.BlockSpec((1, tq, dz), lambda i, j: (i, j, 0)),
        scratch_shapes=[pltpu.VMEM((nk, 2 * dz), jnp.float32)],
        compiler_params=pltpu.CompilerParams(
            dimension_semantics=("parallel", "arbitrary"),
            vmem_limit_bytes=VMEM_LIMIT_BYTES),
    )(xq_p, xkv, wq_s, wkv, wo)
    return out if nq_pad == nq else out[:, :nq]


# ---------------------------------------------------------------------------
# Forward pass
# ---------------------------------------------------------------------------
def multimodal_gridded_tnp_encoder(params, xc, yc, xt):
    mode_names = params["mode_names"]
    dz = params["dz"]
    ppd = params["points_per_dim"]
    b, nt, dx = xt.shape
    num_cells = ppd ** dx

    # x_encoder / y_encoder are Identity => the torch concat+split round-trip over
    # all coordinates is a no-op; skipped here to avoid two extra HBM passes.

    # zt = zt_encoder(xt)
    zt = mlp_apply(xt.reshape(b * nt, dx), params["zt_encoder"],
                   out_dtype=jnp.bfloat16).reshape(b, nt, dz)

    # grid_encoder: all modes fused in one kernel (xy MLP -> nearest-cell mean pool ->
    # per-mode projection, accumulated in VMEM across the mode axis).
    zc_grid = grid_encode(xc, yc, params["xy_encoder"], params["grid_encoder"],
                          mode_names, ppd, dz)

    # TODO(synk): GriddedTransformerEncoder's swin-window / nearest-neighbour masking
    # based on the lattice coordinates (xc_grid) and xt is omitted; full attention over
    # all grid tokens is used instead.
    te = params["transformer_encoder"]
    zc_grid = self_attn_apply(zc_grid, te["self_attn"])                 # residual fused
    zc_grid = mlp_apply(zc_grid.reshape(b * num_cells, dz), te["grid_mlp"],
                        residual_is_input=True).reshape(b, num_cells, dz)
    zt = cross_attn_apply(zt, zc_grid, te["cross_attn"])                # residual fused
    zt = mlp_apply(zt.reshape(b * nt, dz), te["tgt_mlp"],
                   residual_is_input=True,
                   out_dtype=jnp.float32).reshape(b, nt, dz)
    return zt


# ---------------------------------------------------------------------------
# Deterministic parameter construction (weights stored bf16 once, biases fp32)
# ---------------------------------------------------------------------------
def _mk_linear(key, din, dout):
    kw, kb = jax.random.split(key)
    s = 1.0 / math.sqrt(din)
    w = jax.random.uniform(kw, (din, dout), jnp.float32, -s, s).astype(jnp.bfloat16)
    bias = jax.random.uniform(kb, (1, dout), jnp.float32, -s, s)
    return w, bias


def _mk_mlp(key, din, dh, dout):
    k1, k2 = jax.random.split(key)
    return (_mk_linear(k1, din, dh), _mk_linear(k2, dh, dout))


def make_params(key, mode_names, dx, dy, dz, points_per_dim):
    keys = iter(jax.random.split(key, 64))
    return {
        "mode_names": mode_names,
        "dz": dz,
        "points_per_dim": points_per_dim,
        "zt_encoder": _mk_mlp(next(keys), dx, dz, dz),
        "xy_encoder": {m: _mk_mlp(next(keys), dx + dy, dz, dz) for m in mode_names},
        "grid_encoder": {m: _mk_linear(next(keys), dz, dz) for m in mode_names},
        "transformer_encoder": {
            "self_attn": tuple(_mk_linear(next(keys), dz, dz)[0] for _ in range(4)),
            "grid_mlp": _mk_mlp(next(keys), dz, 2 * dz, dz),
            "cross_attn": tuple(_mk_linear(next(keys), dz, dz)[0] for _ in range(4)),
            "tgt_mlp": _mk_mlp(next(keys), dz, 2 * dz, dz),
        },
    }


# ---------------------------------------------------------------------------
if __name__ == "__main__":
    B = 2
    dx = 2          # coordinate dimension
    dy = 3          # per-mode observation dimension (same across modes, as deepcopy implies)
    dz = 32         # latent / token dimension
    nt = 8          # number of target points
    points_per_dim = 8
    mode_names = ["t2m", "wind"]
    nc = {"t2m": 16, "wind": 12}

    key = jax.random.PRNGKey(0)
    kp, kd = jax.random.split(key)
    params = make_params(kp, mode_names, dx, dy, dz, points_per_dim)

    dkeys = iter(jax.random.split(kd, 16))
    xc = {m: jax.random.uniform(next(dkeys), (B, nc[m], dx), jnp.float32, -1.0, 1.0)
          for m in mode_names}
    yc = {m: jax.random.normal(next(dkeys), (B, nc[m], dy), jnp.float32)
          for m in mode_names}
    xt = jax.random.uniform(next(dkeys), (B, nt, dx), jnp.float32, -1.0, 1.0)

    fwd = jax.jit(lambda xc_, yc_, xt_: multimodal_gridded_tnp_encoder(params, xc_, yc_, xt_))
    zt = jax.block_until_ready(fwd(xc, yc, xt))

    assert zt.shape == (B, nt, dz), zt.shape
    assert bool(jnp.all(jnp.isfinite(zt)))
    print("KERNEL_OK")
</pallas_src>

<mosaic_0001>
module attributes {stable_mosaic.version = 11 : i64} {
  func.func @_grid_encode_kernel(%arg0: i32, %arg1: i32, %arg2: i32, %arg3: memref<1x1x1x16xi32, #tpu.memory_space<vmem>>, %arg4: memref<1x1x16x8xf32, #tpu.memory_space<vmem>>, %arg5: memref<1x8x32xbf16, #tpu.memory_space<vmem>>, %arg6: memref<1x1x32xf32, #tpu.memory_space<vmem>>, %arg7: memref<1x32x33xbf16, #tpu.memory_space<vmem>>, %arg8: memref<1x1x33xf32, #tpu.memory_space<vmem>>, %arg9: memref<1x32x32xbf16, #tpu.memory_space<vmem>>, %arg10: memref<1x1x32xf32, #tpu.memory_space<vmem>>, %arg11: memref<1x64x32xbf16, #tpu.memory_space<vmem>>, %arg12: memref<2x16x33xf32, #tpu.memory_space<vmem>>, %arg13: memref<64x32xf32, #tpu.memory_space<vmem>>) attributes {dimension_semantics = [#tpu.dimension_semantics<parallel>, #tpu.dimension_semantics<arbitrary>, #tpu.dimension_semantics<arbitrary>], iteration_bounds = array<i64: 2, 1, 2>, scalar_prefetch = 0 : i64, scratch_operands = 2 : i64, tpu.core_type = #tpu.core_type<tc>, window_params = [{transform_indices = @transform_0, window_bounds = array<i64: 1, 1, 1, 16>}, {transform_indices = @transform_1, window_bounds = array<i64: 1, 1, 16, 8>}, {transform_indices = @transform_2, window_bounds = array<i64: 1, 8, 32>}, {transform_indices = @transform_3, window_bounds = array<i64: 1, 1, 32>}, {transform_indices = @transform_4, window_bounds = array<i64: 1, 32, 33>}, {transform_indices = @transform_5, window_bounds = array<i64: 1, 1, 33>}, {transform_indices = @transform_6, window_bounds = array<i64: 1, 32, 32>}, {transform_indices = @transform_7, window_bounds = array<i64: 1, 1, 32>}, {transform_indices = @transform_8, window_bounds = array<i64: 1, 64, 32>}]} {
    %c0_i32 = arith.constant 0 : i32
    %0 = arith.cmpi eq, %arg1, %c0_i32 : i32
    %1 = arith.extui %0 : i1 to i32
    %c0_i32_0 = arith.constant 0 : i32
    %2 = arith.cmpi ne, %1, %c0_i32_0 : i32
    scf.if %2 {
      %c0_21 = arith.constant 0 : index
      %c0_22 = arith.constant 0 : index
      %c0_23 = arith.constant 0 : index
      %c0_24 = arith.constant 0 : index
      %42 = vector.load %arg4[%c0_21, %c0_22, %c0_23, %c0_24] : memref<1x1x16x8xf32, #tpu.memory_space<vmem>>, vector<1x1x16x8xf32>
      %43 = vector.shape_cast %42 : vector<1x1x16x8xf32> to vector<16x8xf32>
      %44 = arith.truncf %43 : vector<16x8xf32> to vector<16x8xbf16>
      %c0_25 = arith.constant 0 : index
      %c0_26 = arith.constant 0 : index
      %c0_27 = arith.constant 0 : index
      %45 = vector.load %arg5[%c0_25, %c0_26, %c0_27] : memref<1x8x32xbf16, #tpu.memory_space<vmem>>, vector<1x8x32xbf16>
      %46 = vector.shape_cast %45 : vector<1x8x32xbf16> to vector<8x32xbf16>
      %cst_28 = arith.constant dense<0.000000e+00> : vector<16x32xf32>
      %47 = tpu.matmul %44, %46, %cst_28 {dimension_numbers = #tpu.dot_dimension_numbers<[1], [0], [0], [1], [0, 0, 1, 1], [], []>} : vector<16x8xbf16>, vector<8x32xbf16>, vector<16x32xf32> -> vector<16x32xf32>
      %c0_29 = arith.constant 0 : index
      %c0_30 = arith.constant 0 : index
      %c0_31 = arith.constant 0 : index
      %48 = vector.load %arg6[%c0_29, %c0_30, %c0_31] : memref<1x1x32xf32, #tpu.memory_space<vmem>>, vector<1x1x32xf32>
      %49 = vector.shape_cast %48 : vector<1x1x32xf32> to vector<1x32xf32>
      %50 = vector.broadcast %49 : vector<1x32xf32> to vector<16x32xf32>
      %51 = arith.addf %47, %50 : vector<16x32xf32>
      %cst_32 = arith.constant 0.000000e+00 : f32
      %52 = vector.broadcast %cst_32 : f32 to vector<16x32xf32>
      %53 = arith.maximumf %51, %52 : vector<16x32xf32>
      %54 = arith.truncf %53 : vector<16x32xf32> to vector<16x32xbf16>
      %c0_33 = arith.constant 0 : index
      %c0_34 = arith.constant 0 : index
      %c0_35 = arith.constant 0 : index
      %55 = vector.load %arg7[%c0_33, %c0_34, %c0_35] : memref<1x32x33xbf16, #tpu.memory_space<vmem>>, vector<1x32x33xbf16>
      %56 = vector.shape_cast %55 : vector<1x32x33xbf16> to vector<32x33xbf16>
      %cst_36 = arith.constant dense<0.000000e+00> : vector<16x33xf32>
      %57 = tpu.matmul %54, %56, %cst_36 {dimension_numbers = #tpu.dot_dimension_numbers<[1], [0], [0], [1], [0, 0, 1, 1], [], []>} : vector<16x32xbf16>, vector<32x33xbf16>, vector<16x33xf32> -> vector<16x33xf32>
      %c0_37 = arith.constant 0 : index
      %c0_38 = arith.constant 0 : index
      %c0_39 = arith.constant 0 : index
      %58 = vector.load %arg8[%c0_37, %c0_38, %c0_39] : memref<1x1x33xf32, #tpu.memory_space<vmem>>, vector<1x1x33xf32>
      %59 = vector.shape_cast %58 : vector<1x1x33xf32> to vector<1x33xf32>
      %60 = vector.broadcast %59 : vector<1x33xf32> to vector<16x33xf32>
      %61 = arith.addf %57, %60 : vector<16x33xf32>
      %62 = arith.index_cast %arg2 : i32 to index
      %c0_40 = arith.constant 0 : index
      %c0_41 = arith.constant 0 : index
      %63 = vector.load %arg12[%62, %c0_40, %c0_41] : memref<2x16x33xf32, #tpu.memory_space<vmem>>, vector<1x16x33xf32>
      %64 = vector.shape_cast %63 : vector<1x16x33xf32> to vector<16x33xf32>
      %65 = vector.shape_cast %61 : vector<16x33xf32> to vector<1x16x33xf32>
      tpu.vector_store %arg12[%62, %c0_40, %c0_41], %65 {strides = array<i32>} : memref<2x16x33xf32, #tpu.memory_space<vmem>>, vector<1x16x33xf32>,
    } else {
    }
    %c0_i32_1 = arith.constant 0 : i32
    %3 = arith.cmpi eq, %arg2, %c0_i32_1 : i32
    %4 = arith.extui %3 : i1 to i32
    %c0_i32_2 = arith.constant 0 : i32
    %5 = arith.cmpi ne, %4, %c0_i32_2 : i32
    scf.if %5 {
      %cst_21 = arith.constant 0.000000e+00 : f32
      %42 = vector.broadcast %cst_21 : f32 to vector<64x32xf32>
      %c0_22 = arith.constant 0 : index
      %c0_23 = arith.constant 0 : index
      %43 = vector.load %arg13[%c0_22, %c0_23] : memref<64x32xf32, #tpu.memory_space<vmem>>, vector<64x32xf32>
      tpu.vector_store %arg13[%c0_22, %c0_23], %42 {strides = array<i32>} : memref<64x32xf32, #tpu.memory_space<vmem>>, vector<64x32xf32>,
    } else {
    }
    %c0 = arith.constant 0 : index
    %c0_3 = arith.constant 0 : index
    %c0_4 = arith.constant 0 : index
    %c0_5 = arith.constant 0 : index
    %6 = vector.load %arg3[%c0, %c0_3, %c0_4, %c0_5] : memref<1x1x1x16xi32, #tpu.memory_space<vmem>>, vector<1x1x1x16xi32>
    %7 = vector.shape_cast %6 : vector<1x1x1x16xi32> to vector<1x16xi32>
    %8 = tpu.iota {dimensions = array<i32: 0>} : vector<64x16xi32>
    %c64_i32 = arith.constant 64 : i32
    %9 = arith.muli %arg1, %c64_i32 : i32
    %10 = vector.broadcast %9 : i32 to vector<64x16xi32>
    %11 = arith.addi %8, %10 : vector<64x16xi32>
    %12 = vector.broadcast %7 : vector<1x16xi32> to vector<64x16xi32>
    %13 = arith.cmpi eq, %11, %12 : vector<64x16xi32>
    %14 = arith.extui %13 : vector<64x16xi1> to vector<64x16xi32>
    %15 = arith.sitofp %14 : vector<64x16xi32> to vector<64x16xf32>
    %16 = arith.truncf %15 : vector<64x16xf32> to vector<64x16xbf16>
    %17 = arith.index_cast %arg2 : i32 to index
    %c0_6 = arith.constant 0 : index
    %c0_7 = arith.constant 0 : index
    %18 = vector.load %arg12[%17, %c0_6, %c0_7] : memref<2x16x33xf32, #tpu.memory_space<vmem>>, vector<1x16x33xf32>
    %19 = vector.shape_cast %18 : vector<1x16x33xf32> to vector<16x33xf32>
    %20 = arith.truncf %19 : vector<16x33xf32> to vector<16x33xbf16>
    %cst = arith.constant dense<0.000000e+00> : vector<64x33xf32>
    %21 = tpu.matmul %16, %20, %cst {dimension_numbers = #tpu.dot_dimension_numbers<[1], [0], [0], [1], [0, 0, 1, 1], [], []>} : vector<64x16xbf16>, vector<16x33xbf16>, vector<64x33xf32> -> vector<64x33xf32>
    %22 = vector.extract_strided_slice %21 {offsets = [0, 0], sizes = [64, 32], strides = [1, 1]} : vector<64x33xf32> to vector<64x32xf32>
    %23 = vector.extract_strided_slice %21 {offsets = [0, 32], sizes = [64, 1], strides = [1, 1]} : vector<64x33xf32> to vector<64x1xf32>
    %cst_8 = arith.constant 1.000000e+00 : f32
    %24 = vector.broadcast %cst_8 : f32 to vector<64x1xf32>
    %25 = arith.maximumf %23, %24 : vector<64x1xf32>
    %26 = vector.broadcast %25 : vector<64x1xf32> to vector<64x32xf32>
    %27 = arith.divf %22, %26 : vector<64x32xf32>
    %28 = arith.truncf %27 : vector<64x32xf32> to vector<64x32xbf16>
    %c0_9 = arith.constant 0 : index
    %c0_10 = arith.constant 0 : index
    %c0_11 = arith.constant 0 : index
    %29 = vector.load %arg9[%c0_9, %c0_10, %c0_11] : memref<1x32x32xbf16, #tpu.memory_space<vmem>>, vector<1x32x32xbf16>
    %30 = vector.shape_cast %29 : vector<1x32x32xbf16> to vector<32x32xbf16>
    %cst_12 = arith.constant dense<0.000000e+00> : vector<64x32xf32>
    %31 = tpu.matmul %28, %30, %cst_12 {dimension_numbers = #tpu.dot_dimension_numbers<[1], [0], [0], [1], [0, 0, 1, 1], [], []>} : vector<64x32xbf16>, vector<32x32xbf16>, vector<64x32xf32> -> vector<64x32xf32>
    %c0_13 = arith.constant 0 : index
    %c0_14 = arith.constant 0 : index
    %c0_15 = arith.constant 0 : index
    %32 = vector.load %arg10[%c0_13, %c0_14, %c0_15] : memref<1x1x32xf32, #tpu.memory_space<vmem>>, vector<1x1x32xf32>
    %33 = vector.shape_cast %32 : vector<1x1x32xf32> to vector<1x32xf32>
    %34 = vector.broadcast %33 : vector<1x32xf32> to vector<64x32xf32>
    %35 = arith.addf %31, %34 : vector<64x32xf32>
    %c0_16 = arith.constant 0 : index
    %c0_17 = arith.constant 0 : index
    %36 = vector.load %arg13[%c0_16, %c0_17] : memref<64x32xf32, #tpu.memory_space<vmem>>, vector<64x32xf32>
    %37 = arith.addf %36, %35 : vector<64x32xf32>
    %c0_18 = arith.constant 0 : index
    %c0_19 = arith.constant 0 : index
    %38 = vector.load %arg13[%c0_18, %c0_19] : memref<64x32xf32, #tpu.memory_space<vmem>>, vector<64x32xf32>
    tpu.vector_store %arg13[%c0_18, %c0_19], %37 {strides = array<i32>} : memref<64x32xf32, #tpu.memory_space<vmem>>, vector<64x32xf32>,
    %c1_i32 = arith.constant 1 : i32
    %39 = arith.cmpi eq, %arg2, %c1_i32 : i32
    %40 = arith.extui %39 : i1 to i32
    %c0_i32_20 = arith.constant 0 : i32
    %41 = arith.cmpi ne, %40, %c0_i32_20 : i32
    scf.if %41 {
      %c0_21 = arith.constant 0 : index
      %c0_22 = arith.constant 0 : index
      %42 = vector.load %arg13[%c0_21, %c0_22] : memref<64x32xf32, #tpu.memory_space<vmem>>, vector<64x32xf32>
      %43 = arith.truncf %42 : vector<64x32xf32> to vector<64x32xbf16>
      %c0_23 = arith.constant 0 : index
      %c0_24 = arith.constant 0 : index
      %c0_25 = arith.constant 0 : index
      %44 = vector.load %arg11[%c0_23, %c0_24, %c0_25] : memref<1x64x32xbf16, #tpu.memory_space<vmem>>, vector<1x64x32xbf16>
      %45 = vector.shape_cast %44 : vector<1x64x32xbf16> to vector<64x32xbf16>
      %46 = vector.shape_cast %43 : vector<64x32xbf16> to vector<1x64x32xbf16>
      tpu.vector_store %arg11[%c0_23, %c0_24, %c0_25], %46 {strides = array<i32>} : memref<1x64x32xbf16, #tpu.memory_space<vmem>>, vector<1x64x32xbf16>,
    } else {
    }
    return
  }
  func.func @transform_0(%arg0: i32, %arg1: i32, %arg2: i32) -> (i32, i32, i32, i32) {
    %c0_i32 = arith.constant 0 : i32
    %c0_i32_0 = arith.constant 0 : i32
    %c0_i32_1 = arith.constant 0 : i32
    return %arg2, %arg0, %c0_i32, %c0_i32_0 : i32, i32, i32, i32
  }
  func.func @transform_1(%arg0: i32, %arg1: i32, %arg2: i32) -> (i32, i32, i32, i32) {
    %c0_i32 = arith.constant 0 : i32
    %c0_i32_0 = arith.constant 0 : i32
    %c0_i32_1 = arith.constant 0 : i32
    return %arg2, %arg0, %c0_i32, %c0_i32_0 : i32, i32, i32, i32
  }
  func.func @transform_2(%arg0: i32, %arg1: i32, %arg2: i32) -> (i32, i32, i32) {
    %c0_i32 = arith.constant 0 : i32
    %c0_i32_0 = arith.constant 0 : i32
    %c0_i32_1 = arith.constant 0 : i32
    return %arg2, %c0_i32, %c0_i32_0 : i32, i32, i32
  }
  func.func @transform_3(%arg0: i32, %arg1: i32, %arg2: i32) -> (i32, i32, i32) {
    %c0_i32 = arith.constant 0 : i32
    %c0_i32_0 = arith.constant 0 : i32
    %c0_i32_1 = arith.constant 0 : i32
    return %arg2, %c0_i32, %c0_i32_0 : i32, i32, i32
  }
  func.func @transform_4(%arg0: i32, %arg1: i32, %arg2: i32) -> (i32, i32, i32) {
    %c0_i32 = arith.constant 0 : i32
    %c0_i32_0 = arith.constant 0 : i32
    %c0_i32_1 = arith.constant 0 : i32
    return %arg2, %c0_i32, %c0_i32_0 : i32, i32, i32
  }
  func.func @transform_5(%arg0: i32, %arg1: i32, %arg2: i32) -> (i32, i32, i32) {
    %c0_i32 = arith.constant 0 : i32
    %c0_i32_0 = arith.constant 0 : i32
    %c0_i32_1 = arith.constant 0 : i32
    return %arg2, %c0_i32, %c0_i32_0 : i32, i32, i32
  }
  func.func @transform_6(%arg0: i32, %arg1: i32, %arg2: i32) -> (i32, i32, i32) {
    %c0_i32 = arith.constant 0 : i32
    %c0_i32_0 = arith.constant 0 : i32
    %c0_i32_1 = arith.constant 0 : i32
    return %arg2, %c0_i32, %c0_i32_0 : i32, i32, i32
  }
  func.func @transform_7(%arg0: i32, %arg1: i32, %arg2: i32) -> (i32, i32, i32) {
    %c0_i32 = arith.constant 0 : i32
    %c0_i32_0 = arith.constant 0 : i32
    %c0_i32_1 = arith.constant 0 : i32
    return %arg2, %c0_i32, %c0_i32_0 : i32, i32, i32
  }
  func.func @transform_8(%arg0: i32, %arg1: i32, %arg2: i32) -> (i32, i32, i32) {
    %c0_i32 = arith.constant 0 : i32
    %c0_i32_0 = arith.constant 0 : i32
    return %arg0, %arg1, %c0_i32 : i32, i32, i32
  }
}

module attributes {stable_mosaic.version = 11 : i64} {
  func.func @kernel(%arg0: i32, %arg1: memref<128x32xbf16, #tpu.memory_space<vmem>>, %arg2: memref<32x64xbf16, #tpu.memory_space<vmem>>, %arg3: memref<1x64xf32, #tpu.memory_space<vmem>>, %arg4: memref<64x32xbf16, #tpu.memory_space<vmem>>, %arg5: memref<1x32xf32, #tpu.memory_space<vmem>>, %arg6: memref<128x32xbf16, #tpu.memory_space<vmem>>) attributes {dimension_semantics = [#tpu.dimension_semantics<parallel>], iteration_bounds = array<i64: 1>, scalar_prefetch = 0 : i64, scratch_operands = 0 : i64, tpu.core_type = #tpu.core_type<tc>, window_params = [{transform_indices = @transform_0, window_bounds = array<i64: 128, 32>}, {pipeline_mode = #tpu.pipeline_mode<synchronous>, transform_indices = @transform_1, window_bounds = array<i64: 32, 64>}, {pipeline_mode = #tpu.pipeline_mode<synchronous>, transform_indices = @transform_2, window_bounds = array<i64: 1, 64>}, {pipeline_mode = #tpu.pipeline_mode<synchronous>, transform_indices = @transform_3, window_bounds = array<i64: 64, 32>}, {pipeline_mode = #tpu.pipeline_mode<synchronous>, transform_indices = @transform_4, window_bounds = array<i64: 1, 32>}, {transform_indices = @transform_5, window_bounds = array<i64: 128, 32>}]} {
    %c0 = arith.constant 0 : index
    %c0_0 = arith.constant 0 : index
    %0 = vector.load %arg1[%c0, %c0_0] : memref<128x32xbf16, #tpu.memory_space<vmem>>, vector<128x32xbf16>
    %c0_1 = arith.constant 0 : index
    %c0_2 = arith.constant 0 : index
    %1 = vector.load %arg2[%c0_1, %c0_2] : memref<32x64xbf16, #tpu.memory_space<vmem>>, vector<32x64xbf16>
    %cst = arith.constant dense<0.000000e+00> : vector<128x64xf32>
    %2 = tpu.matmul %0, %1, %cst {dimension_numbers = #tpu.dot_dimension_numbers<[1], [0], [0], [1], [0, 0, 1, 1], [], []>} : vector<128x32xbf16>, vector<32x64xbf16>, vector<128x64xf32> -> vector<128x64xf32>
    %c0_3 = arith.constant 0 : index
    %c0_4 = arith.constant 0 : index
    %3 = vector.load %arg3[%c0_3, %c0_4] : memref<1x64xf32, #tpu.memory_space<vmem>>, vector<1x64xf32>
    %4 = vector.broadcast %3 : vector<1x64xf32> to vector<128x64xf32>
    %5 = arith.addf %2, %4 : vector<128x64xf32>
    %cst_5 = arith.constant 0.000000e+00 : f32
    %6 = vector.broadcast %cst_5 : f32 to vector<128x64xf32>
    %7 = arith.maximumf %5, %6 : vector<128x64xf32>
    %8 = arith.truncf %7 : vector<128x64xf32> to vector<128x64xbf16>
    %c0_6 = arith.constant 0 : index
    %c0_7 = arith.constant 0 : index
    %9 = vector.load %arg4[%c0_6, %c0_7] : memref<64x32xbf16, #tpu.memory_space<vmem>>, vector<64x32xbf16>
    %cst_8 = arith.constant dense<0.000000e+00> : vector<128x32xf32>
    %10 = tpu.matmul %8, %9, %cst_8 {dimension_numbers = #tpu.dot_dimension_numbers<[1], [0], [0], [1], [0, 0, 1, 1], [], []>} : vector<128x64xbf16>, vector<64x32xbf16>, vector<128x32xf32> -> vector<128x32xf32>
    %c0_9 = arith.constant 0 : index
    %c0_10 = arith.constant 0 : index
    %11 = vector.load %arg5[%c0_9, %c0_10] : memref<1x32xf32, #tpu.memory_space<vmem>>, vector<1x32xf32>
    %12 = vector.broadcast %11 : vector<1x32xf32> to vector<128x32xf32>
    %13 = arith.addf %10, %12 : vector<128x32xf32>
    %14 = arith.extf %0 : vector<128x32xbf16> to vector<128x32xf32>
    %15 = arith.addf %13, %14 : vector<128x32xf32>
    %16 = arith.truncf %15 : vector<128x32xf32> to vector<128x32xbf16>
    %c0_11 = arith.constant 0 : index
    %c0_12 = arith.constant 0 : index
    %17 = vector.load %arg6[%c0_11, %c0_12] : memref<128x32xbf16, #tpu.memory_space<vmem>>, vector<128x32xbf16>
    tpu.vector_store %arg6[%c0_11, %c0_12], %16 {strides = array<i32>} : memref<128x32xbf16, #tpu.memory_space<vmem>>, vector<128x32xbf16>,
    return
  }
  func.func @transform_0(%arg0: i32) -> (i32, i32) {
    %c0_i32 = arith.constant 0 : i32
    %c0_i32_0 = arith.constant 0 : i32
    return %arg0, %c0_i32 : i32, i32
  }
  func.func @transform_1(%arg0: i32) -> (i32, i32) {
    %c0_i32 = arith.constant 0 : i32
    %c0_i32_0 = arith.constant 0 : i32
    %c0_i32_1 = arith.constant 0 : i32
    return %c0_i32, %c0_i32_0 : i32, i32
  }
  func.func @transform_2(%arg0: i32) -> (i32, i32) {
    %c0_i32 = arith.constant 0 : i32
    %c0_i32_0 = arith.constant 0 : i32
    %c0_i32_1 = arith.constant 0 : i32
    return %c0_i32, %c0_i32_0 : i32, i32
  }
  func.func @transform_3(%arg0: i32) -> (i32, i32) {
    %c0_i32 = arith.constant 0 : i32
    %c0_i32_0 = arith.constant 0 : i32
    %c0_i32_1 = arith.constant 0 : i32
    return %c0_i32, %c0_i32_0 : i32, i32
  }
  func.func @transform_4(%arg0: i32) -> (i32, i32) {
    %c0_i32 = arith.constant 0 : i32
    %c0_i32_0 = arith.constant 0 : i32
    %c0_i32_1 = arith.constant 0 : i32
    return %c0_i32, %c0_i32_0 : i32, i32
  }
  func.func @transform_5(%arg0: i32) -> (i32, i32) {
    %c0_i32 = arith.constant 0 : i32
    %c0_i32_0 = arith.constant 0 : i32
    return %arg0, %c0_i32 : i32, i32
  }
}

module attributes {stable_mosaic.version = 11 : i64} {
  func.func @_self_attn_kernel(%arg0: i32, %arg1: i32, %arg2: memref<1x64x32xbf16, #tpu.memory_space<vmem>>, %arg3: memref<1x64x32xbf16, #tpu.memory_space<vmem>>, %arg4: memref<32x96xbf16, #tpu.memory_space<vmem>>, %arg5: memref<32x32xbf16, #tpu.memory_space<vmem>>, %arg6: memref<1x64x32xbf16, #tpu.memory_space<vmem>>, %arg7: memref<64x96xf32, #tpu.memory_space<vmem>>) attributes {dimension_semantics = [#tpu.dimension_semantics<parallel>, #tpu.dimension_semantics<arbitrary>], iteration_bounds = array<i64: 2, 1>, scalar_prefetch = 0 : i64, scratch_operands = 1 : i64, tpu.core_type = #tpu.core_type<tc>, window_params = [{transform_indices = @transform_0, window_bounds = array<i64: 1, 64, 32>}, {transform_indices = @transform_1, window_bounds = array<i64: 1, 64, 32>}, {pipeline_mode = #tpu.pipeline_mode<synchronous>, transform_indices = @transform_2, window_bounds = array<i64: 32, 96>}, {pipeline_mode = #tpu.pipeline_mode<synchronous>, transform_indices = @transform_3, window_bounds = array<i64: 32, 32>}, {transform_indices = @transform_4, window_bounds = array<i64: 1, 64, 32>}]} {
    %c0_i32 = arith.constant 0 : i32
    %0 = arith.cmpi eq, %arg1, %c0_i32 : i32
    %1 = arith.extui %0 : i1 to i32
    %c0_i32_0 = arith.constant 0 : i32
    %2 = arith.cmpi ne, %1, %c0_i32_0 : i32
    scf.if %2 {
      %c0_15 = arith.constant 0 : index
      %c0_16 = arith.constant 0 : index
      %c0_17 = arith.constant 0 : index
      %38 = vector.load %arg3[%c0_15, %c0_16, %c0_17] : memref<1x64x32xbf16, #tpu.memory_space<vmem>>, vector<1x64x32xbf16>
      %39 = vector.shape_cast %38 : vector<1x64x32xbf16> to vector<64x32xbf16>
      %c0_18 = arith.constant 0 : index
      %c0_19 = arith.constant 0 : index
      %40 = vector.load %arg4[%c0_18, %c0_19] : memref<32x96xbf16, #tpu.memory_space<vmem>>, vector<32x96xbf16>
      %cst_20 = arith.constant dense<0.000000e+00> : vector<64x96xf32>
      %41 = tpu.matmul %39, %40, %cst_20 {dimension_numbers = #tpu.dot_dimension_numbers<[1], [0], [0], [1], [0, 0, 1, 1], [], []>} : vector<64x32xbf16>, vector<32x96xbf16>, vector<64x96xf32> -> vector<64x96xf32>
      %c0_21 = arith.constant 0 : index
      %c0_22 = arith.constant 0 : index
      %42 = vector.load %arg7[%c0_21, %c0_22] : memref<64x96xf32, #tpu.memory_space<vmem>>, vector<64x96xf32>
      tpu.vector_store %arg7[%c0_21, %c0_22], %41 {strides = array<i32>} : memref<64x96xf32, #tpu.memory_space<vmem>>, vector<64x96xf32>,
    } else {
    }
    %c64_i32 = arith.constant 64 : i32
    %3 = arith.muli %arg1, %c64_i32 : i32
    %4 = tpu.assume_multiple %3, 8 : i32
    %5 = arith.index_cast %4 : i32 to index
    %c0 = arith.constant 0 : index
    %6 = vector.load %arg7[%5, %c0] : memref<64x96xf32, #tpu.memory_space<vmem>>, vector<64x96xf32>
    %7 = vector.extract_strided_slice %6 {offsets = [0, 0], sizes = [64, 32], strides = [1, 1]} : vector<64x96xf32> to vector<64x32xf32>
    %c0_1 = arith.constant 0 : index
    %c0_2 = arith.constant 0 : index
    %8 = vector.load %arg7[%c0_1, %c0_2] : memref<64x96xf32, #tpu.memory_space<vmem>>, vector<64x96xf32>
    %9 = vector.extract_strided_slice %8 {offsets = [0, 32], sizes = [64, 32], strides = [1, 1]} : vector<64x96xf32> to vector<64x32xf32>
    %10 = vector.extract_strided_slice %8 {offsets = [0, 64], sizes = [64, 32], strides = [1, 1]} : vector<64x96xf32> to vector<64x32xf32>
    %11 = arith.truncf %7 : vector<64x32xf32> to vector<64x32xbf16>
    %12 = arith.truncf %9 : vector<64x32xf32> to vector<64x32xbf16>
    %cst = arith.constant dense<0.000000e+00> : vector<64x64xf32>
    %13 = tpu.matmul %11, %12, %cst {dimension_numbers = #tpu.dot_dimension_numbers<[1], [1], [0], [0], [0, 0, 1, 0], [], []>} : vector<64x32xbf16>, vector<64x32xbf16>, vector<64x64xf32> -> vector<64x64xf32>
    %cst_3 = arith.constant dense<0xFF800000> : vector<64xf32>
    %14 = vector.multi_reduction <maximumf>, %13, %cst_3 [1] : vector<64x64xf32> to vector<64xf32>
    %15 = vector.shape_cast %14 : vector<64xf32> to vector<64x1xf32>
    %16 = vector.broadcast %15 : vector<64x1xf32> to vector<64x64xf32>
    %17 = arith.subf %13, %16 : vector<64x64xf32>
    %18 = math.exp %17 : vector<64x64xf32>
    %cst_4 = arith.constant dense<0.000000e+00> : vector<64xf32>
    %19 = vector.multi_reduction <add>, %18, %cst_4 [1] : vector<64x64xf32> to vector<64xf32>
    %20 = vector.shape_cast %19 : vector<64xf32> to vector<64x1xf32>
    %21 = tpu.reciprocal %20 {approx = true} : vector<64x1xf32> -> vector<64x1xf32>
    %22 = vector.broadcast %21 : vector<64x1xf32> to vector<64x64xf32>
    %23 = arith.mulf %18, %22 : vector<64x64xf32>
    %24 = arith.truncf %23 : vector<64x64xf32> to vector<64x64xbf16>
    %25 = arith.truncf %10 : vector<64x32xf32> to vector<64x32xbf16>
    %cst_5 = arith.constant dense<0.000000e+00> : vector<64x32xf32>
    %26 = tpu.matmul %24, %25, %cst_5 {dimension_numbers = #tpu.dot_dimension_numbers<[1], [0], [0], [1], [0, 0, 1, 1], [], []>} : vector<64x64xbf16>, vector<64x32xbf16>, vector<64x32xf32> -> vector<64x32xf32>
    %27 = arith.truncf %26 : vector<64x32xf32> to vector<64x32xbf16>
    %c0_6 = arith.constant 0 : index
    %c0_7 = arith.constant 0 : index
    %28 = vector.load %arg5[%c0_6, %c0_7] : memref<32x32xbf16, #tpu.memory_space<vmem>>, vector<32x32xbf16>
    %cst_8 = arith.constant dense<0.000000e+00> : vector<64x32xf32>
    %29 = tpu.matmul %27, %28, %cst_8 {dimension_numbers = #tpu.dot_dimension_numbers<[1], [0], [0], [1], [0, 0, 1, 1], [], []>} : vector<64x32xbf16>, vector<32x32xbf16>, vector<64x32xf32> -> vector<64x32xf32>
    %c0_9 = arith.constant 0 : index
    %c0_10 = arith.constant 0 : index
    %c0_11 = arith.constant 0 : index
    %30 = vector.load %arg2[%c0_9, %c0_10, %c0_11] : memref<1x64x32xbf16, #tpu.memory_space<vmem>>, vector<1x64x32xbf16>
    %31 = vector.shape_cast %30 : vector<1x64x32xbf16> to vector<64x32xbf16>
    %32 = arith.extf %31 : vector<64x32xbf16> to vector<64x32xf32>
    %33 = arith.addf %32, %29 : vector<64x32xf32>
    %34 = arith.truncf %33 : vector<64x32xf32> to vector<64x32xbf16>
    %c0_12 = arith.constant 0 : index
    %c0_13 = arith.constant 0 : index
    %c0_14 = arith.constant 0 : index
    %35 = vector.load %arg6[%c0_12, %c0_13, %c0_14] : memref<1x64x32xbf16, #tpu.memory_space<vmem>>, vector<1x64x32xbf16>
    %36 = vector.shape_cast %35 : vector<1x64x32xbf16> to vector<64x32xbf16>
    %37 = vector.shape_cast %34 : vector<64x32xbf16> to vector<1x64x32xbf16>
    tpu.vector_store %arg6[%c0_12, %c0_13, %c0_14], %37 {strides = array<i32>} : memref<1x64x32xbf16, #tpu.memory_space<vmem>>, vector<1x64x32xbf16>,
    return
  }
  func.func @transform_0(%arg0: i32, %arg1: i32) -> (i32, i32, i32) {
    %c0_i32 = arith.constant 0 : i32
    %c0_i32_0 = arith.constant 0 : i32
    return %arg0, %arg1, %c0_i32 : i32, i32, i32
  }
  func.func @transform_1(%arg0: i32, %arg1: i32) -> (i32, i32, i32) {
    %c0_i32 = arith.constant 0 : i32
    %c0_i32_0 = arith.constant 0 : i32
    %c0_i32_1 = arith.constant 0 : i32
    return %arg0, %c0_i32, %c0_i32_0 : i32, i32, i32
  }
  func.func @transform_2(%arg0: i32, %arg1: i32) -> (i32, i32) {
    %c0_i32 = arith.constant 0 : i32
    %c0_i32_0 = arith.constant 0 : i32
    %c0_i32_1 = arith.constant 0 : i32
    return %c0_i32, %c0_i32_0 : i32, i32
  }
  func.func @transform_3(%arg0: i32, %arg1: i32) -> (i32, i32) {
    %c0_i32 = arith.constant 0 : i32
    %c0_i32_0 = arith.constant 0 : i32
    %c0_i32_1 = arith.constant 0 : i32
    return %c0_i32, %c0_i32_0 : i32, i32
  }
  func.func @transform_4(%arg0: i32, %arg1: i32) -> (i32, i32, i32) {
    %c0_i32 = arith.constant 0 : i32
    %c0_i32_0 = arith.constant 0 : i32
    return %arg0, %arg1, %c0_i32 : i32, i32, i32
  }
}

module attributes {stable_mosaic.version = 11 : i64} {
  func.func @kernel(%arg0: i32, %arg1: memref<16x8xf32, #tpu.memory_space<vmem>>, %arg2: memref<8x32xbf16, #tpu.memory_space<vmem>>, %arg3: memref<1x32xf32, #tpu.memory_space<vmem>>, %arg4: memref<32x32xbf16, #tpu.memory_space<vmem>>, %arg5: memref<1x32xf32, #tpu.memory_space<vmem>>, %arg6: memref<16x32xbf16, #tpu.memory_space<vmem>>) attributes {dimension_semantics = [#tpu.dimension_semantics<parallel>], iteration_bounds = array<i64: 1>, scalar_prefetch = 0 : i64, scratch_operands = 0 : i64, tpu.core_type = #tpu.core_type<tc>, window_params = [{transform_indices = @transform_0, window_bounds = array<i64: 16, 8>}, {pipeline_mode = #tpu.pipeline_mode<synchronous>, transform_indices = @transform_1, window_bounds = array<i64: 8, 32>}, {pipeline_mode = #tpu.pipeline_mode<synchronous>, transform_indices = @transform_2, window_bounds = array<i64: 1, 32>}, {pipeline_mode = #tpu.pipeline_mode<synchronous>, transform_indices = @transform_3, window_bounds = array<i64: 32, 32>}, {pipeline_mode = #tpu.pipeline_mode<synchronous>, transform_indices = @transform_4, window_bounds = array<i64: 1, 32>}, {transform_indices = @transform_5, window_bounds = array<i64: 16, 32>}]} {
    %c0 = arith.constant 0 : index
    %c0_0 = arith.constant 0 : index
    %0 = vector.load %arg1[%c0, %c0_0] : memref<16x8xf32, #tpu.memory_space<vmem>>, vector<16x8xf32>
    %1 = arith.truncf %0 : vector<16x8xf32> to vector<16x8xbf16>
    %c0_1 = arith.constant 0 : index
    %c0_2 = arith.constant 0 : index
    %2 = vector.load %arg2[%c0_1, %c0_2] : memref<8x32xbf16, #tpu.memory_space<vmem>>, vector<8x32xbf16>
    %cst = arith.constant dense<0.000000e+00> : vector<16x32xf32>
    %3 = tpu.matmul %1, %2, %cst {dimension_numbers = #tpu.dot_dimension_numbers<[1], [0], [0], [1], [0, 0, 1, 1], [], []>} : vector<16x8xbf16>, vector<8x32xbf16>, vector<16x32xf32> -> vector<16x32xf32>
    %c0_3 = arith.constant 0 : index
    %c0_4 = arith.constant 0 : index
    %4 = vector.load %arg3[%c0_3, %c0_4] : memref<1x32xf32, #tpu.memory_space<vmem>>, vector<1x32xf32>
    %5 = vector.broadcast %4 : vector<1x32xf32> to vector<16x32xf32>
    %6 = arith.addf %3, %5 : vector<16x32xf32>
    %cst_5 = arith.constant 0.000000e+00 : f32
    %7 = vector.broadcast %cst_5 : f32 to vector<16x32xf32>
    %8 = arith.maximumf %6, %7 : vector<16x32xf32>
    %9 = arith.truncf %8 : vector<16x32xf32> to vector<16x32xbf16>
    %c0_6 = arith.constant 0 : index
    %c0_7 = arith.constant 0 : index
    %10 = vector.load %arg4[%c0_6, %c0_7] : memref<32x32xbf16, #tpu.memory_space<vmem>>, vector<32x32xbf16>
    %cst_8 = arith.constant dense<0.000000e+00> : vector<16x32xf32>
    %11 = tpu.matmul %9, %10, %cst_8 {dimension_numbers = #tpu.dot_dimension_numbers<[1], [0], [0], [1], [0, 0, 1, 1], [], []>} : vector<16x32xbf16>, vector<32x32xbf16>, vector<16x32xf32> -> vector<16x32xf32>
    %c0_9 = arith.constant 0 : index
    %c0_10 = arith.constant 0 : index
    %12 = vector.load %arg5[%c0_9, %c0_10] : memref<1x32xf32, #tpu.memory_space<vmem>>, vector<1x32xf32>
    %13 = vector.broadcast %12 : vector<1x32xf32> to vector<16x32xf32>
    %14 = arith.addf %11, %13 : vector<16x32xf32>
    %15 = arith.truncf %14 : vector<16x32xf32> to vector<16x32xbf16>
    %c0_11 = arith.constant 0 : index
    %c0_12 = arith.constant 0 : index
    %16 = vector.load %arg6[%c0_11, %c0_12] : memref<16x32xbf16, #tpu.memory_space<vmem>>, vector<16x32xbf16>
    tpu.vector_store %arg6[%c0_11, %c0_12], %15 {strides = array<i32>} : memref<16x32xbf16, #tpu.memory_space<vmem>>, vector<16x32xbf16>,
    return
  }
  func.func @transform_0(%arg0: i32) -> (i32, i32) {
    %c0_i32 = arith.constant 0 : i32
    %c0_i32_0 = arith.constant 0 : i32
    return %arg0, %c0_i32 : i32, i32
  }
  func.func @transform_1(%arg0: i32) -> (i32, i32) {
    %c0_i32 = arith.constant 0 : i32
    %c0_i32_0 = arith.constant 0 : i32
    %c0_i32_1 = arith.constant 0 : i32
    return %c0_i32, %c0_i32_0 : i32, i32
  }
  func.func @transform_2(%arg0: i32) -> (i32, i32) {
    %c0_i32 = arith.constant 0 : i32
    %c0_i32_0 = arith.constant 0 : i32
    %c0_i32_1 = arith.constant 0 : i32
    return %c0_i32, %c0_i32_0 : i32, i32
  }
  func.func @transform_3(%arg0: i32) -> (i32, i32) {
    %c0_i32 = arith.constant 0 : i32
    %c0_i32_0 = arith.constant 0 : i32
    %c0_i32_1 = arith.constant 0 : i32
    return %c0_i32, %c0_i32_0 : i32, i32
  }
  func.func @transform_4(%arg0: i32) -> (i32, i32) {
    %c0_i32 = arith.constant 0 : i32
    %c0_i32_0 = arith.constant 0 : i32
    %c0_i32_1 = arith.constant 0 : i32
    return %c0_i32, %c0_i32_0 : i32, i32
  }
  func.func @transform_5(%arg0: i32) -> (i32, i32) {
    %c0_i32 = arith.constant 0 : i32
    %c0_i32_0 = arith.constant 0 : i32
    return %arg0, %c0_i32 : i32, i32
  }
}

module attributes {stable_mosaic.version = 11 : i64} {
  func.func @_cross_attn_kernel(%arg0: i32, %arg1: i32, %arg2: memref<1x8x32xbf16, #tpu.memory_space<vmem>>, %arg3: memref<1x64x32xbf16, #tpu.memory_space<vmem>>, %arg4: memref<32x32xbf16, #tpu.memory_space<vmem>>, %arg5: memref<32x64xbf16, #tpu.memory_space<vmem>>, %arg6: memref<32x32xbf16, #tpu.memory_space<vmem>>, %arg7: memref<1x8x32xbf16, #tpu.memory_space<vmem>>, %arg8: memref<64x64xf32, #tpu.memory_space<vmem>>) attributes {dimension_semantics = [#tpu.dimension_semantics<parallel>, #tpu.dimension_semantics<arbitrary>], iteration_bounds = array<i64: 2, 1>, scalar_prefetch = 0 : i64, scratch_operands = 1 : i64, tpu.core_type = #tpu.core_type<tc>, window_params = [{transform_indices = @transform_0, window_bounds = array<i64: 1, 8, 32>}, {transform_indices = @transform_1, window_bounds = array<i64: 1, 64, 32>}, {pipeline_mode = #tpu.pipeline_mode<synchronous>, transform_indices = @transform_2, window_bounds = array<i64: 32, 32>}, {pipeline_mode = #tpu.pipeline_mode<synchronous>, transform_indices = @transform_3, window_bounds = array<i64: 32, 64>}, {pipeline_mode = #tpu.pipeline_mode<synchronous>, transform_indices = @transform_4, window_bounds = array<i64: 32, 32>}, {transform_indices = @transform_5, window_bounds = array<i64: 1, 8, 32>}]} {
    %c0_i32 = arith.constant 0 : i32
    %0 = arith.cmpi eq, %arg1, %c0_i32 : i32
    %1 = arith.extui %0 : i1 to i32
    %c0_i32_0 = arith.constant 0 : i32
    %2 = arith.cmpi ne, %1, %c0_i32_0 : i32
    scf.if %2 {
      %c0_17 = arith.constant 0 : index
      %c0_18 = arith.constant 0 : index
      %c0_19 = arith.constant 0 : index
      %35 = vector.load %arg3[%c0_17, %c0_18, %c0_19] : memref<1x64x32xbf16, #tpu.memory_space<vmem>>, vector<1x64x32xbf16>
      %36 = vector.shape_cast %35 : vector<1x64x32xbf16> to vector<64x32xbf16>
      %c0_20 = arith.constant 0 : index
      %c0_21 = arith.constant 0 : index
      %37 = vector.load %arg5[%c0_20, %c0_21] : memref<32x64xbf16, #tpu.memory_space<vmem>>, vector<32x64xbf16>
      %cst_22 = arith.constant dense<0.000000e+00> : vector<64x64xf32>
      %38 = tpu.matmul %36, %37, %cst_22 {dimension_numbers = #tpu.dot_dimension_numbers<[1], [0], [0], [1], [0, 0, 1, 1], [], []>} : vector<64x32xbf16>, vector<32x64xbf16>, vector<64x64xf32> -> vector<64x64xf32>
      %c0_23 = arith.constant 0 : index
      %c0_24 = arith.constant 0 : index
      %39 = vector.load %arg8[%c0_23, %c0_24] : memref<64x64xf32, #tpu.memory_space<vmem>>, vector<64x64xf32>
      tpu.vector_store %arg8[%c0_23, %c0_24], %38 {strides = array<i32>} : memref<64x64xf32, #tpu.memory_space<vmem>>, vector<64x64xf32>,
    } else {
    }
    %c0 = arith.constant 0 : index
    %c0_1 = arith.constant 0 : index
    %c0_2 = arith.constant 0 : index
    %3 = vector.load %arg2[%c0, %c0_1, %c0_2] : memref<1x8x32xbf16, #tpu.memory_space<vmem>>, vector<1x8x32xbf16>
    %4 = vector.shape_cast %3 : vector<1x8x32xbf16> to vector<8x32xbf16>
    %c0_3 = arith.constant 0 : index
    %c0_4 = arith.constant 0 : index
    %5 = vector.load %arg4[%c0_3, %c0_4] : memref<32x32xbf16, #tpu.memory_space<vmem>>, vector<32x32xbf16>
    %cst = arith.constant dense<0.000000e+00> : vector<8x32xf32>
    %6 = tpu.matmul %4, %5, %cst {dimension_numbers = #tpu.dot_dimension_numbers<[1], [0], [0], [1], [0, 0, 1, 1], [], []>} : vector<8x32xbf16>, vector<32x32xbf16>, vector<8x32xf32> -> vector<8x32xf32>
    %c0_5 = arith.constant 0 : index
    %c0_6 = arith.constant 0 : index
    %7 = vector.load %arg8[%c0_5, %c0_6] : memref<64x64xf32, #tpu.memory_space<vmem>>, vector<64x64xf32>
    %8 = vector.extract_strided_slice %7 {offsets = [0, 0], sizes = [64, 32], strides = [1, 1]} : vector<64x64xf32> to vector<64x32xf32>
    %9 = vector.extract_strided_slice %7 {offsets = [0, 32], sizes = [64, 32], strides = [1, 1]} : vector<64x64xf32> to vector<64x32xf32>
    %10 = arith.truncf %6 : vector<8x32xf32> to vector<8x32xbf16>
    %11 = arith.truncf %8 : vector<64x32xf32> to vector<64x32xbf16>
    %cst_7 = arith.constant dense<0.000000e+00> : vector<8x64xf32>
    %12 = tpu.matmul %10, %11, %cst_7 {dimension_numbers = #tpu.dot_dimension_numbers<[1], [1], [0], [0], [0, 0, 1, 0], [], []>} : vector<8x32xbf16>, vector<64x32xbf16>, vector<8x64xf32> -> vector<8x64xf32>
    %cst_8 = arith.constant dense<0xFF800000> : vector<8xf32>
    %13 = vector.multi_reduction <maximumf>, %12, %cst_8 [1] : vector<8x64xf32> to vector<8xf32>
    %14 = vector.shape_cast %13 : vector<8xf32> to vector<8x1xf32>
    %15 = vector.broadcast %14 : vector<8x1xf32> to vector<8x64xf32>
    %16 = arith.subf %12, %15 : vector<8x64xf32>
    %17 = math.exp %16 : vector<8x64xf32>
    %cst_9 = arith.constant dense<0.000000e+00> : vector<8xf32>
    %18 = vector.multi_reduction <add>, %17, %cst_9 [1] : vector<8x64xf32> to vector<8xf32>
    %19 = vector.shape_cast %18 : vector<8xf32> to vector<8x1xf32>
    %20 = tpu.reciprocal %19 {approx = true} : vector<8x1xf32> -> vector<8x1xf32>
    %21 = vector.broadcast %20 : vector<8x1xf32> to vector<8x64xf32>
    %22 = arith.mulf %17, %21 : vector<8x64xf32>
    %23 = arith.truncf %22 : vector<8x64xf32> to vector<8x64xbf16>
    %24 = arith.truncf %9 : vector<64x32xf32> to vector<64x32xbf16>
    %cst_10 = arith.constant dense<0.000000e+00> : vector<8x32xf32>
    %25 = tpu.matmul %23, %24, %cst_10 {dimension_numbers = #tpu.dot_dimension_numbers<[1], [0], [0], [1], [0, 0, 1, 1], [], []>} : vector<8x64xbf16>, vector<64x32xbf16>, vector<8x32xf32> -> vector<8x32xf32>
    %26 = arith.truncf %25 : vector<8x32xf32> to vector<8x32xbf16>
    %c0_11 = arith.constant 0 : index
    %c0_12 = arith.constant 0 : index
    %27 = vector.load %arg6[%c0_11, %c0_12] : memref<32x32xbf16, #tpu.memory_space<vmem>>, vector<32x32xbf16>
    %cst_13 = arith.constant dense<0.000000e+00> : vector<8x32xf32>
    %28 = tpu.matmul %26, %27, %cst_13 {dimension_numbers = #tpu.dot_dimension_numbers<[1], [0], [0], [1], [0, 0, 1, 1], [], []>} : vector<8x32xbf16>, vector<32x32xbf16>, vector<8x32xf32> -> vector<8x32xf32>
    %29 = arith.extf %4 : vector<8x32xbf16> to vector<8x32xf32>
    %30 = arith.addf %29, %28 : vector<8x32xf32>
    %31 = arith.truncf %30 : vector<8x32xf32> to vector<8x32xbf16>
    %c0_14 = arith.constant 0 : index
    %c0_15 = arith.constant 0 : index
    %c0_16 = arith.constant 0 : index
    %32 = vector.load %arg7[%c0_14, %c0_15, %c0_16] : memref<1x8x32xbf16, #tpu.memory_space<vmem>>, vector<1x8x32xbf16>
    %33 = vector.shape_cast %32 : vector<1x8x32xbf16> to vector<8x32xbf16>
    %34 = vector.shape_cast %31 : vector<8x32xbf16> to vector<1x8x32xbf16>
    tpu.vector_store %arg7[%c0_14, %c0_15, %c0_16], %34 {strides = array<i32>} : memref<1x8x32xbf16, #tpu.memory_space<vmem>>, vector<1x8x32xbf16>,
    return
  }
  func.func @transform_0(%arg0: i32, %arg1: i32) -> (i32, i32, i32) {
    %c0_i32 = arith.constant 0 : i32
    %c0_i32_0 = arith.constant 0 : i32
    return %arg0, %arg1, %c0_i32 : i32, i32, i32
  }
  func.func @transform_1(%arg0: i32, %arg1: i32) -> (i32, i32, i32) {
    %c0_i32 = arith.constant 0 : i32
    %c0_i32_0 = arith.constant 0 : i32
    %c0_i32_1 = arith.constant 0 : i32
    return %arg0, %c0_i32, %c0_i32_0 : i32, i32, i32
  }
  func.func @transform_2(%arg0: i32, %arg1: i32) -> (i32, i32) {
    %c0_i32 = arith.constant 0 : i32
    %c0_i32_0 = arith.constant 0 : i32
    %c0_i32_1 = arith.constant 0 : i32
    return %c0_i32, %c0_i32_0 : i32, i32
  }
  func.func @transform_3(%arg0: i32, %arg1: i32) -> (i32, i32) {
    %c0_i32 = arith.constant 0 : i32
    %c0_i32_0 = arith.constant 0 : i32
    %c0_i32_1 = arith.constant 0 : i32
    return %c0_i32, %c0_i32_0 : i32, i32
  }
  func.func @transform_4(%arg0: i32, %arg1: i32) -> (i32, i32) {
    %c0_i32 = arith.constant 0 : i32
    %c0_i32_0 = arith.constant 0 : i32
    %c0_i32_1 = arith.constant 0 : i32
    return %c0_i32, %c0_i32_0 : i32, i32
  }
  func.func @transform_5(%arg0: i32, %arg1: i32) -> (i32, i32, i32) {
    %c0_i32 = arith.constant 0 : i32
    %c0_i32_0 = arith.constant 0 : i32
    return %arg0, %arg1, %c0_i32 : i32, i32, i32
  }
}

module attributes {stable_mosaic.version = 11 : i64} {
  func.func @kernel(%arg0: i32, %arg1: memref<16x32xbf16, #tpu.memory_space<vmem>>, %arg2: memref<32x64xbf16, #tpu.memory_space<vmem>>, %arg3: memref<1x64xf32, #tpu.memory_space<vmem>>, %arg4: memref<64x32xbf16, #tpu.memory_space<vmem>>, %arg5: memref<1x32xf32, #tpu.memory_space<vmem>>, %arg6: memref<16x32xf32, #tpu.memory_space<vmem>>) attributes {dimension_semantics = [#tpu.dimension_semantics<parallel>], iteration_bounds = array<i64: 1>, scalar_prefetch = 0 : i64, scratch_operands = 0 : i64, tpu.core_type = #tpu.core_type<tc>, window_params = [{transform_indices = @transform_0, window_bounds = array<i64: 16, 32>}, {pipeline_mode = #tpu.pipeline_mode<synchronous>, transform_indices = @transform_1, window_bounds = array<i64: 32, 64>}, {pipeline_mode = #tpu.pipeline_mode<synchronous>, transform_indices = @transform_2, window_bounds = array<i64: 1, 64>}, {pipeline_mode = #tpu.pipeline_mode<synchronous>, transform_indices = @transform_3, window_bounds = array<i64: 64, 32>}, {pipeline_mode = #tpu.pipeline_mode<synchronous>, transform_indices = @transform_4, window_bounds = array<i64: 1, 32>}, {transform_indices = @transform_5, window_bounds = array<i64: 16, 32>}]} {
    %c0 = arith.constant 0 : index
    %c0_0 = arith.constant 0 : index
    %0 = vector.load %arg1[%c0, %c0_0] : memref<16x32xbf16, #tpu.memory_space<vmem>>, vector<16x32xbf16>
    %c0_1 = arith.constant 0 : index
    %c0_2 = arith.constant 0 : index
    %1 = vector.load %arg2[%c0_1, %c0_2] : memref<32x64xbf16, #tpu.memory_space<vmem>>, vector<32x64xbf16>
    %cst = arith.constant dense<0.000000e+00> : vector<16x64xf32>
    %2 = tpu.matmul %0, %1, %cst {dimension_numbers = #tpu.dot_dimension_numbers<[1], [0], [0], [1], [0, 0, 1, 1], [], []>} : vector<16x32xbf16>, vector<32x64xbf16>, vector<16x64xf32> -> vector<16x64xf32>
    %c0_3 = arith.constant 0 : index
    %c0_4 = arith.constant 0 : index
    %3 = vector.load %arg3[%c0_3, %c0_4] : memref<1x64xf32, #tpu.memory_space<vmem>>, vector<1x64xf32>
    %4 = vector.broadcast %3 : vector<1x64xf32> to vector<16x64xf32>
    %5 = arith.addf %2, %4 : vector<16x64xf32>
    %cst_5 = arith.constant 0.000000e+00 : f32
    %6 = vector.broadcast %cst_5 : f32 to vector<16x64xf32>
    %7 = arith.maximumf %5, %6 : vector<16x64xf32>
    %8 = arith.truncf %7 : vector<16x64xf32> to vector<16x64xbf16>
    %c0_6 = arith.constant 0 : index
    %c0_7 = arith.constant 0 : index
    %9 = vector.load %arg4[%c0_6, %c0_7] : memref<64x32xbf16, #tpu.memory_space<vmem>>, vector<64x32xbf16>
    %cst_8 = arith.constant dense<0.000000e+00> : vector<16x32xf32>
    %10 = tpu.matmul %8, %9, %cst_8 {dimension_numbers = #tpu.dot_dimension_numbers<[1], [0], [0], [1], [0, 0, 1, 1], [], []>} : vector<16x64xbf16>, vector<64x32xbf16>, vector<16x32xf32> -> vector<16x32xf32>
    %c0_9 = arith.constant 0 : index
    %c0_10 = arith.constant 0 : index
    %11 = vector.load %arg5[%c0_9, %c0_10] : memref<1x32xf32, #tpu.memory_space<vmem>>, vector<1x32xf32>
    %12 = vector.broadcast %11 : vector<1x32xf32> to vector<16x32xf32>
    %13 = arith.addf %10, %12 : vector<16x32xf32>
    %14 = arith.extf %0 : vector<16x32xbf16> to vector<16x32xf32>
    %15 = arith.addf %13, %14 : vector<16x32xf32>
    %c0_11 = arith.constant 0 : index
    %c0_12 = arith.constant 0 : index
    %16 = vector.load %arg6[%c0_11, %c0_12] : memref<16x32xf32, #tpu.memory_space<vmem>>, vector<16x32xf32>
    tpu.vector_store %arg6[%c0_11, %c0_12], %15 {strides = array<i32>} : memref<16x32xf32, #tpu.memory_space<vmem>>, vector<16x32xf32>,
    return
  }
  func.func @transform_0(%arg0: i32) -> (i32, i32) {
    %c0_i32 = arith.constant 0 : i32
    %c0_i32_0 = arith.constant 0 : i32
    return %arg0, %c0_i32 : i32, i32
  }
  func.func @transform_1(%arg0: i32) -> (i32, i32) {
    %c0_i32 = arith.constant 0 : i32
    %c0_i32_0 = arith.constant 0 : i32
    %c0_i32_1 = arith.constant 0 : i32
    return %c0_i32, %c0_i32_0 : i32, i32
  }
  func.func @transform_2(%arg0: i32) -> (i32, i32) {
    %c0_i32 = arith.constant 0 : i32
    %c0_i32_0 = arith.constant 0 : i32
    %c0_i32_1 = arith.constant 0 : i32
    return %c0_i32, %c0_i32_0 : i32, i32
  }
  func.func @transform_3(%arg0: i32) -> (i32, i32) {
    %c0_i32 = arith.constant 0 : i32
    %c0_i32_0 = arith.constant 0 : i32
    %c0_i32_1 = arith.constant 0 : i32
    return %c0_i32, %c0_i32_0 : i32, i32
  }
  func.func @transform_4(%arg0: i32) -> (i32, i32) {
    %c0_i32 = arith.constant 0 : i32
    %c0_i32_0 = arith.constant 0 : i32
    %c0_i32_1 = arith.constant 0 : i32
    return %c0_i32, %c0_i32_0 : i32, i32
  }
  func.func @transform_5(%arg0: i32) -> (i32, i32) {
    %c0_i32 = arith.constant 0 : i32
    %c0_i32_0 = arith.constant 0 : i32
    return %arg0, %c0_i32 : i32, i32
  }
}

</mosaic_0001>

<bundles_post_ra>
// kernel: _lambda_.6
= control target key start
LH: loop header
LB: loop body
LE: loop exit
PB: predicated region body
PF: predicated region fallthrough
CT: control target
= control target key end

     0   :  { %vm36_vm0 = vcmask 1043456   ;;  %v200_v0 = vmov 0.0   ;;  %vm201_vm1 = vmmov 0   ;;  %vm32_vm2 = vcmask 64512   ;;  %s259_s1 = inlined_call_operand.vmem [shape: bf16[8,32], index: 1, kind: input, shape index: {}]   ;;  %s260_s0 = inlined_call_operand.vmem [shape: f32[16,8], index: 0, kind: input, shape index: {}]   ;;  %s261_s3 = inlined_call_operand.vmem [shape: bf16[32,32], index: 3, kind: input, shape index: {}]   ;;  %s262_s2 = inlined_call_operand.vmem [shape: f32[1,32], index: 2, kind: input, shape index: {}]   ;;  %s263_s4 = inlined_call_operand.vmem [shape: f32[1,32], index: 4, kind: input, shape index: {}]   ;;  %s264_s5 = inlined_call_operand.vmem [shape: bf16[16,32], index: 5, kind: output, shape index: {}]  }
   0x1   :  { %182 = vmatprep.subr.bf16.mxu0 %v200_v0  ;;  %v24_v1 = vld [vmem:[%s259_s1] sm:$0xf]  ;;  %184 = vmatprep.mubr.msk.bf16.mxu0 %vm201_vm1, %v200_v0  ;;  %v22_v3 = vld [vmem:[%s260_s0 + $0x8] sm:$0xff]  ;;  %vm107_vm3 = vcmask 261120   ;;  %vm160_vm4 = vcmask 257024  }
   0x2   :  { %v21_v2 = vld [vmem:[%s260_s0] sm:$0xff]  ;;  %v38_v4 = vsel %vm36_vm0, %v24_v1, 0  ;;  %188 = vmatprep.subr.bf16.mxu1 %v200_v0  ;;  %192 = vmatprep.mubr.msk.bf16.mxu1 %vm201_vm1, %v200_v0  ;;  %v199_v7 = vld [vmem:[%s261_s3 + $0x8] sm:$0xff]  }
   0x3   :  { %v23_v5 = vpack.c.bf16 %v22_v3, %v21_v2  ;;  %183 = vmatpush3.bf16.msra.mxu0 %v38_v4  ;;  %v198_v6 = vld [vmem:[%s261_s3] sm:$0xff]  }
   0x4   :  { %189 = vmatpush3.bf16.msra.mxu1 %v198_v6  ;;  %v167_v8 = vld [vmem:[%s262_s2] ss:$0 sm:$0xff] }
   0x5   :  { %190 = vmatprep.subr.bf16.mxu1 %v200_v0  ;;  %v169_v18 = vld [vmem:[%s263_s4] ss:$0 sm:$0xff] }
   0x6   :  { %185 = vmatmul.mubr.msk.bf16.vlgmr.msra.gmra.mrb[0].mxu0 %vm32_vm2, %v23_v5 }
   0x8   :  { %191 = vmatpush3.bf16.msra.mxu1 %v199_v7 }
  0xd9   :  { %v74_v9 = vpop.f32.mrb[0].mxu0 }
  0xda   :  { %v75_v10 = vadd.f32 %v167_v8, %v74_v9  ;;  %v186_v11 = vpop.f32.mrb[1].mxu0 }
  0xdb   :  { %v77_v12 = vpop.f32.mrb[2].mxu0 }
  0xdc   :  { %v78_v13 = vadd.f32 %v167_v8, %v77_v12  ;;  %v187_v14 = vpop.f32.mrb[3].mxu0  ;;  %v81_v15 = vmax.f32 %v75_v10, 0.0 }
  0xde   :  { %v82_v16 = vmax.f32 %v78_v13, 0.0 }
  0xe0   :  { %v83_v17 = vpack.c.bf16 %v82_v16, %v81_v15 }
  0xe2   :  { %193 = vmatmul.mubr.msk.bf16.vlgmr.msra.gmra.mrb[0].mxu1 %vm107_vm3, %v83_v17 }
 0x1b5   :  { %v145_v19 = vpop.f32.mrb[0].mxu1 }
 0x1b6   :  { %v146_v20 = vadd.f32 %v169_v18, %v145_v19  ;;  %v194_v21 = vpop.f32.mrb[1].mxu1 }
 0x1b7   :  { %v148_v22 = vpop.f32.mrb[2].mxu1 }
 0x1b8   :  { %v175_v23 = vpack.c.bf16 %v146_v20, %v146_v20  ;;  %v149_v24 = vadd.f32 %v169_v18, %v148_v22  ;;  %v195_v25 = vpop.f32.mrb[3].mxu1 }
 0x1ba   :  { %161 = vst.msk [vmem:[%s264_s5] sm:$0xf] %vm160_vm4, %v175_v23  ;;  %v176_v26 = vpack.c.bf16 %v149_v24, %v149_v24 }
 0x1bc   :  { %162 = vst.msk [vmem:[%s264_s5 + $0x4] sm:$0xf] %vm160_vm4, %v176_v26 }

// kernel: _lambda_.9
= control target key start
LH: loop header
LB: loop body
LE: loop exit
PB: predicated region body
PF: predicated region fallthrough
CT: control target
= control target key end

     0   :  { %vm100_vm0 = vcmask 261120   ;;  %vm285_vm1 = vcmask 523264   ;;  %vm503_vm2 = vcmask 257024   ;;  %s892_s1 = inlined_call_operand.vmem [shape: bf16[32,64], index: 1, kind: input, shape index: {}]   ;;  %s893_s0 = inlined_call_operand.vmem [shape: bf16[128,32], index: 0, kind: input, shape index: {}]   ;;  %s894_s3 = inlined_call_operand.vmem [shape: bf16[64,32], index: 3, kind: input, shape index: {}]   ;;  %s895_s2 = inlined_call_operand.vmem [shape: f32[1,64], index: 2, kind: input, shape index: {}]   ;;  %s896_s4 = inlined_call_operand.vmem [shape: f32[1,32], index: 4, kind: input, shape index: {}]   ;;  %s897_s5 = inlined_call_operand.vmem [shape: bf16[128,32], index: 5, kind: output, shape index: {}]  }
   0x1   :  { %v654_v0 = vld [vmem:[%s892_s1] sm:$0xff]   ;;  %v655_v1 = vld [vmem:[%s892_s1 + $0x8] sm:$0xff]   ;;  %v725_v4 = vld [vmem:[%s893_s0 + $0x10] sm:$0xff]  }
   0x2   :  { %610 = vmatprep.subr.bf16.mxu0 %v654_v0  ;;  %v715_v2 = vld [vmem:[%s893_s0] sm:$0xff]   ;;  %v720_v3 = vld [vmem:[%s893_s0 + $0x8] sm:$0xff]   ;;  %v742_v7 = vld [vmem:[%s893_s0 + $0x18] sm:$0xff]  }
   0x3   :  { %611 = vmatpush3.bf16.msra.mxu0 %v654_v0  ;;  %614 = vmatprep.mubr.msk.bf16.mxu0 %vm100_vm0, %v715_v2  ;;  %v664_v5 = vld [vmem:[%s894_s3] sm:$0xff]   ;;  %v665_v6 = vld [vmem:[%s894_s3 + $0x8] sm:$0xff]   ;;  %v761_v10 = vld [vmem:[%s893_s0 + $0x30] sm:$0xff]  }
   0x4   :  { %612 = vmatprep.subr.bf16.mxu0 %v655_v1  ;;  %630 = vmatprep.subr.bf16.mxu1 %v664_v5  ;;  %v747_v8 = vld [vmem:[%s893_s0 + $0x20] sm:$0xff]   ;;  %v756_v9 = vld [vmem:[%s893_s0 + $0x28] sm:$0xff]   ;;  %v770_v11 = vld [vmem:[%s893_s0 + $0x38] sm:$0xff]  }
   0x5   :  { %631 = vmatpush3.bf16.msra.mxu1 %v664_v5  ;;  %v666_v12 = vld [vmem:[%s894_s3 + $0x10] sm:$0xff]   ;;  %v667_v13 = vld [vmem:[%s894_s3 + $0x18] sm:$0xff]   ;;  %v524_v14 = vld [vmem:[%s895_s2] ss:$0 sm:$0xff] }
   0x6   :  { %632 = vmatprep.subr.bf16.mxu1 %v665_v6 }
   0x7   :  { %613 = vmatpush3.bf16.msra.mxu0 %v655_v1 }
   0x9   :  { %633 = vmatpush3.bf16.msra.mxu1 %v665_v6 }
   0xa   :  { %615 = vmatmul.mubr.msk.bf16.vlgmr.msra.gmra.mrb[0].mxu0 %vm100_vm0, %v720_v3  ;;  %634 = vmatprep.subr.bf16.mxu1 %v666_v12 }
   0xb   :  { %618 = vmatprep.mubr.msk.bf16.mxu0 %vm100_vm0, %v725_v4 }
   0xd   :  { %635 = vmatpush3.bf16.msra.mxu1 %v666_v12 }
   0xe   :  { %636 = vmatprep.subr.bf16.mxu1 %v667_v13 }
  0x11   :  { %637 = vmatpush3.bf16.msra.mxu1 %v667_v13 }
  0x12   :  { %619 = vmatmul.mubr.msk.bf16.gmra.mrb[4].mxu0 %vm100_vm0, %v742_v7 }
  0x13   :  { %622 = vmatprep.mubr.msk.bf16.mxu0 %vm100_vm0, %v747_v8 }
  0x1a   :  { %623 = vmatmul.mubr.msk.bf16.gmra.mrb[8].mxu0 %vm100_vm0, %v756_v9 }
  0x1b   :  { %626 = vmatprep.mubr.msk.bf16.mxu0 %vm100_vm0, %v761_v10 }
  0x22   :  { %627 = vmatmul.mubr.msk.bf16.gmra.mrb[12].mxu0 %vm100_vm0, %v770_v11 }
  0xdd   :  { %v616_v15 = vpop.f32.mrb[0].mxu0 }
  0xde   :  { %v168_v16 = vadd.f32 %v616_v15, %v524_v14  ;;  %v159_v17 = vpop.f32.mrb[1].mxu0 }
  0xdf   :  { %v160_v18 = vadd.f32 %v524_v14, %v159_v17  ;;  %v617_v19 = vpop.f32.mrb[2].mxu0  ;;  %v409_v17 = vunpack.c.l.bf16 %v720_v3 }
  0xe0   :  { %v171_v20 = vadd.f32 %v617_v19, %v524_v14  ;;  %v162_v21 = vpop.f32.mrb[3].mxu0  ;;  %v224_v23 = vmax.f32 %v168_v16, 0.0  ;;  %v794_v16 = vld [vmem:[%s896_s4] ss:$0 sm:$0xff] }
  0xe1   :  { %v163_v22 = vadd.f32 %v524_v14, %v162_v21  ;;  %v222_v25 = vmax.f32 %v160_v18, 0.0  ;;  %v407_v18 = vunpack.c.l.bf16 %v715_v2  ;;  %v410_v21 = vunpack.c.h.bf16 %v720_v3 }
  0xe2   :  { %v225_v24 = vmax.f32 %v171_v20, 0.0  ;;  %v413_v3 = vunpack.c.l.bf16 %v742_v7 }
  0xe3   :  { %v223_v26 = vmax.f32 %v163_v22, 0.0  ;;  %v408_v22 = vunpack.c.h.bf16 %v715_v2 }
  0xe4   :  { %v239_v27 = vpack.c.bf16 %v225_v24, %v224_v23 }
  0xe5   :  { %v620_v28 = vpop.f32.mrb[4].mxu0  ;;  %v238_v29 = vpack.c.bf16 %v223_v26, %v222_v25 }
  0xe6   :  { %v184_v30 = vadd.f32 %v620_v28, %v524_v14  ;;  %v175_v31 = vpop.f32.mrb[5].mxu0 }
  0xe7   :  { %v176_v32 = vadd.f32 %v524_v14, %v175_v31  ;;  %v621_v33 = vpop.f32.mrb[6].mxu0  ;;  %638 = vmatprep.mubr.msk.bf16.mxu1 %vm285_vm1, %v238_v29 }
  0xe8   :  { %v187_v34 = vadd.f32 %v621_v33, %v524_v14  ;;  %v178_v35 = vpop.f32.mrb[7].mxu0  ;;  %639 = vmatmul.mubr.msk.bf16.vlgmr.msra.gmra.mrb[0].mxu1 %vm285_vm1, %v239_v27  ;;  %v228_v37 = vmax.f32 %v184_v30, 0.0 }
  0xe9   :  { %v179_v36 = vadd.f32 %v524_v14, %v178_v35  ;;  %v226_v39 = vmax.f32 %v176_v32, 0.0 }
  0xea   :  { %v229_v38 = vmax.f32 %v187_v34, 0.0 }
  0xeb   :  { %v227_v40 = vmax.f32 %v179_v36, 0.0  ;;  %v411_v36 = vunpack.c.l.bf16 %v725_v4 }
  0xec   :  { %v241_v41 = vpack.c.bf16 %v229_v38, %v228_v37 }
  0xed   :  { %v240_v42 = vpack.c.bf16 %v227_v40, %v226_v39  ;;  %v624_v43 = vpop.f32.mrb[8].mxu0  ;;  %v414_v39 = vunpack.c.h.bf16 %v742_v7 }
  0xee   :  { %v200_v44 = vadd.f32 %v624_v43, %v524_v14  ;;  %v191_v45 = vpop.f32.mrb[9].mxu0 }
  0xef   :  { %v192_v46 = vadd.f32 %v524_v14, %v191_v45  ;;  %v625_v47 = vpop.f32.mrb[10].mxu0  ;;  %642 = vmatprep.mubr.msk.bf16.mxu1 %vm285_vm1, %v240_v42  ;;  %v412_v42 = vunpack.c.h.bf16 %v725_v4 }
  0xf0   :  { %v203_v48 = vadd.f32 %v625_v47, %v524_v14  ;;  %v194_v49 = vpop.f32.mrb[11].mxu0  ;;  %643 = vmatmul.mubr.msk.bf16.gmra.mrb[4].mxu1 %vm285_vm1, %v241_v41  ;;  %v232_v51 = vmax.f32 %v200_v44, 0.0 }
  0xf1   :  { %v195_v50 = vadd.f32 %v524_v14, %v194_v49  ;;  %v230_v53 = vmax.f32 %v192_v46, 0.0 }
  0xf2   :  { %v233_v52 = vmax.f32 %v203_v48, 0.0 }
  0xf3   :  { %v231_v54 = vmax.f32 %v195_v50, 0.0 }
  0xf4   :  { %v243_v55 = vpack.c.bf16 %v233_v52, %v232_v51  ;;  %v417_v52 = vunpack.c.l.bf16 %v756_v9 }
  0xf5   :  { %v242_v56 = vpack.c.bf16 %v231_v54, %v230_v53  ;;  %v628_v57 = vpop.f32.mrb[12].mxu0  ;;  %v415_v54 = vunpack.c.l.bf16 %v747_v8 }
  0xf6   :  { %v216_v58 = vadd.f32 %v628_v57, %v524_v14  ;;  %v207_v59 = vpop.f32.mrb[13].mxu0  ;;  %v418_v57 = vunpack.c.h.bf16 %v756_v9 }
  0xf7   :  { %v208_v60 = vadd.f32 %v524_v14, %v207_v59  ;;  %v629_v61 = vpop.f32.mrb[14].mxu0  ;;  %646 = vmatprep.mubr.msk.bf16.mxu1 %vm285_vm1, %v242_v56 }
  0xf8   :  { %v219_v62 = vadd.f32 %v629_v61, %v524_v14  ;;  %v210_v63 = vpop.f32.mrb[15].mxu0  ;;  %647 = vmatmul.mubr.msk.bf16.gmra.mrb[8].mxu1 %vm285_vm1, %v243_v55  ;;  %v236_v1 = vmax.f32 %v216_v58, 0.0 }
  0xf9   :  { %v211_v0 = vadd.f32 %v524_v14, %v210_v63  ;;  %v234_v6 = vmax.f32 %v208_v60, 0.0  ;;  %v416_v60 = vunpack.c.h.bf16 %v747_v8 }
  0xfa   :  { %v237_v5 = vmax.f32 %v219_v62, 0.0 }
  0xfb   :  { %v235_v12 = vmax.f32 %v211_v0, 0.0 }
  0xfc   :  { %v245_v13 = vpack.c.bf16 %v237_v5, %v236_v1 }
  0xfd   :  { %v244_v15 = vpack.c.bf16 %v235_v12, %v234_v6 }
  0xff   :  { %650 = vmatprep.mubr.msk.bf16.mxu1 %vm285_vm1, %v244_v15  ;;  %v421_v15 = vunpack.c.l.bf16 %v770_v11 }
 0x100   :  { %651 = vmatmul.mubr.msk.bf16.gmra.mrb[12].mxu1 %vm285_vm1, %v245_v13 }
 0x1bb   :  { %v640_v14 = vpop.f32.mrb[0].mxu1 }
 0x1bc   :  { %v353_v19 = vadd.f32 %v640_v14, %v794_v16  ;;  %v344_v20 = vpop.f32.mrb[1].mxu1 }
 0x1bd   :  { %v345_v23 = vadd.f32 %v794_v16, %v344_v20  ;;  %v641_v24 = vpop.f32.mrb[2].mxu1  ;;  %v422_v20 = vunpack.c.h.bf16 %v770_v11 }
 0x1be   :  { %v425_v25 = vadd.f32 %v409_v17, %v353_v19  ;;  %v356_v26 = vadd.f32 %v641_v24, %v794_v16  ;;  %v347_v27 = vpop.f32.mrb[3].mxu1 }
 0x1bf   :  { %v423_v28 = vadd.f32 %v407_v18, %v345_v23  ;;  %v348_v29 = vadd.f32 %v794_v16, %v347_v27  ;;  %v419_v18 = vunpack.c.l.bf16 %v761_v10  ;;  %v420_v23 = vunpack.c.h.bf16 %v761_v10 }
 0x1c0   :  { %v574_v30 = vpack.c.bf16 %v425_v25, %v425_v25  ;;  %v426_v31 = vadd.f32 %v410_v21, %v356_v26 }
 0x1c1   :  { %v572_v32 = vpack.c.bf16 %v423_v28, %v423_v28  ;;  %v424_v33 = vadd.f32 %v408_v22, %v348_v29 }
 0x1c2   :  { %506 = vst.msk [vmem:[%s897_s5 + $0x8] sm:$0xf] %vm503_vm2, %v574_v30  ;;  %v575_v2 = vpack.c.bf16 %v426_v31, %v426_v31 }
 0x1c3   :  { %504 = vst.msk [vmem:[%s897_s5] sm:$0xf] %vm503_vm2, %v572_v32  ;;  %v573_v34 = vpack.c.bf16 %v424_v33, %v424_v33  ;;  %v644_v35 = vpop.f32.mrb[4].mxu1 }
 0x1c4   :  { %507 = vst.msk [vmem:[%s897_s5 + $0xc] sm:$0xf] %vm503_vm2, %v575_v2  ;;  %v369_v37 = vadd.f32 %v644_v35, %v794_v16  ;;  %v360_v38 = vpop.f32.mrb[5].mxu1 }
 0x1c5   :  { %505 = vst.msk [vmem:[%s897_s5 + $0x4] sm:$0xf] %vm503_vm2, %v573_v34  ;;  %v361_v40 = vadd.f32 %v794_v16, %v360_v38  ;;  %v645_v41 = vpop.f32.mrb[6].mxu1 }
 0x1c6   :  { %v429_v43 = vadd.f32 %v413_v3, %v369_v37  ;;  %v372_v44 = vadd.f32 %v645_v41, %v794_v16  ;;  %v363_v45 = vpop.f32.mrb[7].mxu1 }
 0x1c7   :  { %v427_v46 = vadd.f32 %v411_v36, %v361_v40  ;;  %v364_v47 = vadd.f32 %v794_v16, %v363_v45 }
 0x1c8   :  { %v578_v48 = vpack.c.bf16 %v429_v43, %v429_v43  ;;  %v430_v49 = vadd.f32 %v414_v39, %v372_v44 }
 0x1c9   :  { %v576_v7 = vpack.c.bf16 %v427_v46, %v427_v46  ;;  %v428_v50 = vadd.f32 %v412_v42, %v364_v47 }
 0x1ca   :  { %510 = vst.msk [vmem:[%s897_s5 + $0x18] sm:$0xf] %vm503_vm2, %v578_v48  ;;  %v579_v51 = vpack.c.bf16 %v430_v49, %v430_v49 }
 0x1cb   :  { %508 = vst.msk [vmem:[%s897_s5 + $0x10] sm:$0xf] %vm503_vm2, %v576_v7  ;;  %v577_v4 = vpack.c.bf16 %v428_v50, %v428_v50  ;;  %v648_v53 = vpop.f32.mrb[8].mxu1 }
 0x1cc   :  { %511 = vst.msk [vmem:[%s897_s5 + $0x1c] sm:$0xf] %vm503_vm2, %v579_v51  ;;  %v385_v55 = vadd.f32 %v648_v53, %v794_v16  ;;  %v376_v56 = vpop.f32.mrb[9].mxu1 }
 0x1cd   :  { %509 = vst.msk [vmem:[%s897_s5 + $0x14] sm:$0xf] %vm503_vm2, %v577_v4  ;;  %v377_v58 = vadd.f32 %v794_v16, %v376_v56  ;;  %v649_v59 = vpop.f32.mrb[10].mxu1 }
 0x1ce   :  { %v433_v61 = vadd.f32 %v417_v52, %v385_v55  ;;  %v388_v62 = vadd.f32 %v649_v59, %v794_v16  ;;  %v379_v63 = vpop.f32.mrb[11].mxu1 }
 0x1cf   :  { %v431_v0 = vadd.f32 %v415_v54, %v377_v58  ;;  %v380_v1 = vadd.f32 %v794_v16, %v379_v63 }
 0x1d0   :  { %v582_v5 = vpack.c.bf16 %v433_v61, %v433_v61  ;;  %v434_v6 = vadd.f32 %v418_v57, %v388_v62 }
 0x1d1   :  { %v580_v9 = vpack.c.bf16 %v431_v0, %v431_v0  ;;  %v432_v12 = vadd.f32 %v416_v60, %v380_v1 }
 0x1d2   :  { %514 = vst.msk [vmem:[%s897_s5 + $0x28] sm:$0xf] %vm503_vm2, %v582_v5  ;;  %v583_v13 = vpack.c.bf16 %v434_v6, %v434_v6 }
 0x1d3   :  { %512 = vst.msk [vmem:[%s897_s5 + $0x20] sm:$0xf] %vm503_vm2, %v580_v9  ;;  %v581_v8 = vpack.c.bf16 %v432_v12, %v432_v12  ;;  %v652_v17 = vpop.f32.mrb[12].mxu1 }
 0x1d4   :  { %515 = vst.msk [vmem:[%s897_s5 + $0x2c] sm:$0xf] %vm503_vm2, %v583_v13  ;;  %v401_v14 = vadd.f32 %v652_v17, %v794_v16  ;;  %v392_v19 = vpop.f32.mrb[13].mxu1 }
 0x1d5   :  { %513 = vst.msk [vmem:[%s897_s5 + $0x24] sm:$0xf] %vm503_vm2, %v581_v8  ;;  %v393_v21 = vadd.f32 %v794_v16, %v392_v19  ;;  %v653_v22 = vpop.f32.mrb[14].mxu1 }
 0x1d6   :  { %v437_v24 = vadd.f32 %v421_v15, %v401_v14  ;;  %v404_v25 = vadd.f32 %v653_v22, %v794_v16  ;;  %v395_v26 = vpop.f32.mrb[15].mxu1 }
 0x1d7   :  { %v435_v27 = vadd.f32 %v419_v18, %v393_v21  ;;  %v396_v28 = vadd.f32 %v794_v16, %v395_v26 }
 0x1d8   :  { %v586_v29 = vpack.c.bf16 %v437_v24, %v437_v24  ;;  %v438_v30 = vadd.f32 %v422_v20, %v404_v25 }
 0x1d9   :  { %v584_v11 = vpack.c.bf16 %v435_v27, %v435_v27  ;;  %v436_v31 = vadd.f32 %v420_v23, %v396_v28 }
 0x1da   :  { %518 = vst.msk [vmem:[%s897_s5 + $0x38] sm:$0xf] %vm503_vm2, %v586_v29  ;;  %v587_v32 = vpack.c.bf16 %v438_v30, %v438_v30 }
 0x1db   :  { %516 = vst.msk [vmem:[%s897_s5 + $0x30] sm:$0xf] %vm503_vm2, %v584_v11  ;;  %v585_v10 = vpack.c.bf16 %v436_v31, %v436_v31 }
 0x1dc   :  { %519 = vst.msk [vmem:[%s897_s5 + $0x3c] sm:$0xf] %vm503_vm2, %v587_v32 }
 0x1dd   :  { %517 = vst.msk [vmem:[%s897_s5 + $0x34] sm:$0xf] %vm503_vm2, %v585_v10 }

// kernel: _lambda_.7
= control target key start
LH: loop header
LB: loop body
LE: loop exit
PB: predicated region body
PF: predicated region fallthrough
CT: control target
= control target key end

     0   :  { %s1464_s27 = smov 0   ;;  %s1466_s28 = smov 0   ;;  %s1624_s0 = inlined_call_operand.vmem [shape: s32[2,2,1,16], index: 0, kind: input, shape index: {}]   ;;  %s1625_s1 = inlined_call_operand.vmem [shape: f32[2,2,16,8], index: 1, kind: input, shape index: {}]   ;;  %s1626_s2 = inlined_call_operand.vmem [shape: bf16[2,8,32], index: 2, kind: input, shape index: {}]   ;;  %s1627_s3 = inlined_call_operand.vmem [shape: f32[2,1,32], index: 3, kind: input, shape index: {}]   ;;  %s1628_s4 = inlined_call_operand.vmem [shape: bf16[2,32,33], index: 4, kind: input, shape index: {}]   ;;  %s1629_s5 = inlined_call_operand.vmem [shape: f32[2,1,33], index: 5, kind: input, shape index: {}]   ;;  %s1630_s6 = inlined_call_operand.vmem [shape: bf16[2,32,32], index: 6, kind: input, shape index: {}]   ;;  %s1631_s7 = inlined_call_operand.vmem [shape: f32[2,1,32], index: 7, kind: input, shape index: {}]   ;;  %s1632_s8 = inlined_call_operand.vmem [shape: bf16[2,64,32], index: 8, kind: output, shape index: {}]  }
   0x1   :  { %s1468_s29 = smov 0   ;;  %s1470_s30 = smov 0  }
   0x2   :  { %s1472_s9 = smov 0  }
   0x3 LB: > { %1635 = sst [smem:[#allocation4_spill]] %s1405_s29  ;;  %s30_s10 = sadd.s32 1, %s1405_s29  ;;  %s1413_s9 = sphi %s1472_s9, %s18_s9   ;;  %s1409_s30 = sphi %s1470_s30, %s1642_s30   ;;  %s1405_s29 = sphi %s1468_s29, %s1641_s29   ;;  %s1401_s28 = sphi %s1466_s28, %s1640_s28   ;;  %s1397_s27 = sphi %s1464_s27, %s1639_s27  }
   0x4   : > { %1636 = sst [smem:[#allocation5_spill]] %s1409_s30  ;;  %s37_s11 = sadd.s32 1, %s1409_s30 }
   0x5   : > { %p31_p0 = scmp.ge.s32.totalorder %s30_s10, 2  ;;  %p1194_p1 = scmp.ge.s32.totalorder %s1413_s9, 1 }
   0x6   : > { %p356_p2 = scmp.lt.s32.totalorder %s1413_s9, 5 }
   0x7   : > { %s1644_s10 = smov (%p31_p0, %s30_s10), 0  ;;  %s1646_s11 = smov (!%p31_p0, %s37_s11), %s1409_s30 }
   0x8   : > { %1637 = sst [smem:[#allocation6_spill]] %s1644_s10  ;;  %p357_p3 = pnand %p1194_p1, %p356_p2 }
   0x9   : > { %p39_p4 = scmp.ge.s32.totalorder %s1646_s11, 2  ;;  %p428_p5 = scmp.lt.s32.totalorder (!%p357_p3), %s1397_s27, 1  ;;  %v1415_v0 = vmov (!%p357_p3), 0.0   ;;  %vm1416_vm0 = vmmov (!%p357_p3), 0   ;;  %vm497_vm1 = vcmask (!%p357_p3), 1043456   ;;  %vm493_vm2 = vcmask (!%p357_p3), 64512  }
   0xa   : > { %360 = sbr.rel (%p357_p3) target bundleno = 1080 (0x438), region = 52  ;;  %p430_p6 = scmp.lt.s32.totalorder (!%p357_p3), %s1401_s28, 1  ;;  %1273 = vmatprep.subr.bf16.mxu0 (!%p357_p3), %v1415_v0  ;;  %1275 = vmatprep.mubr.msk.bf16.mxu0 (!%p357_p3), %vm1416_vm0, %v1415_v0  ;;  %vm568_vm3 = vcmask (!%p357_p3), 261120   ;;  %vm615_vm4 = vcmask (!%p357_p3), 269312  }
   0xb   : > { %s1648_s11 = smov (%p39_p4, %s1646_s11), 0  ;;  %1279 = vmatprep.subr.bf16.mxu1 (!%p357_p3), %v1415_v0  ;;  %1283 = vmatprep.mubr.msk.bf16.mxu1 (!%p357_p3), %vm1416_vm0, %v1415_v0  ;;  %p1213_p7 = scmp.ne.s32.totalorder (!%p357_p3), %s1397_s27, 0 }
   0xc   : > { %1638 = sst [smem:[#allocation7_spill]] %s1648_s11 }
  0x11   : > { %s1500_s12 = scalar_select %p428_p5, %s1397_s27, 1 }
  0x12   : > { %s1650_s28 = smov (!%p430_p6, %s1401_s28), 1  ;;  %v1417_v25 = vmov (!%p1213_p7), 0.0  }
  0x13   : > { %s1195_s13 = sshll.u32 %s1500_s12, 1  ;;  %s1197_s14 = sshll.u32 %s1500_s12, 2  ;;  %623 = vst.msk [vmem:[#allocation3] sm:$0xff] (!%p1213_p7), %vm568_vm3, %v1417_v25  ;;  %624 = vst.msk [vmem:[#allocation3 + $0x8] sm:$0xff] (!%p1213_p7), %vm568_vm3, %v1417_v25 }
  0x14   : > { %s1506_s15 = sadd.s32 %s1195_s13, %s1650_s28  ;;  %s1196_s16 = sshll.u32 %s1650_s28, 1  ;;  %625 = vst.msk [vmem:[#allocation3 + $0x10] sm:$0xff] (!%p1213_p7), %vm568_vm3, %v1417_v25  ;;  %626 = vst.msk [vmem:[#allocation3 + $0x18] sm:$0xff] (!%p1213_p7), %vm568_vm3, %v1417_v25 }
  0x15   : > { %s434_s19 = scalar_lea.vmem %s1624_s0, %s1506_s15  ;;  %s441_s20 = sadd.s32 %s1197_s14, %s1196_s16  ;;  %627 = vst.msk [vmem:[#allocation3 + $0x20] sm:$0xff] (!%p1213_p7), %vm568_vm3, %v1417_v25  ;;  %628 = vst.msk [vmem:[#allocation3 + $0x28] sm:$0xff] (!%p1213_p7), %vm568_vm3, %v1417_v25 }
  0x16   : > { %s1198_s21 = sshll.u32 %s441_s20, 3  ;;  %s447_s24 = scalar_lea.vmem %s1626_s2, %s1197_s14  ;;  %629 = vst.msk [vmem:[#allocation3 + $0x30] sm:$0xff] (!%p1213_p7), %vm568_vm3, %v1417_v25  ;;  %630 = vst.msk [vmem:[#allocation3 + $0x38] sm:$0xff] (!%p1213_p7), %vm568_vm3, %v1417_v25 }
  0x17   : > { %s443_s11 = scalar_lea.vmem %s1625_s1, %s1198_s21  ;;  %s466_s30 = scalar_lea.vmem %s1631_s7, %s1500_s12  ;;  %v485_v1 = vld [vmem:[%s447_s24] sm:$0xf] }
  0x18   : > { %s1248_s29 = sshll.u32 %s1650_s28, 5  ;;  %v482_v2 = vld [vmem:[%s443_s11] sm:$0xff]  ;;  %v483_v3 = vld [vmem:[%s443_s11 + $0x8] sm:$0xff]  ;;  %v499_v4 = vsel %vm497_vm1, %v485_v1, 0  ;;  %s1246_s14 = sshll.u32 %s1500_s12, 4 }
  0x19   : > { %s1525_s18 = scalar_lea.vmem %s1632_s8, %s1248_s29  ;;  %v484_v5 = vpack.c.bf16 %v483_v3, %v482_v2  ;;  %1274 = vmatpush3.bf16.msra.mxu0 %v499_v4  ;;  %s455_s10 = scalar_lea.vmem %s1628_s4, %s1246_s14 }
  0x1a   : > { %v1353_v6 = vld [vmem:[%s455_s10] sm:$0xff]   ;;  %v1354_v7 = vld [vmem:[%s455_s10 + $0x8] sm:$0xff]   ;;  %s1535_s29 = scalar_lea.vmem %s1630_s6, %s1246_s14  ;;  %s450_s24 = scalar_lea.vmem %s1627_s3, %s1500_s12 }
  0x1b   : > { %1280 = vmatpush3.bf16.msra.mxu1 %v1353_v6  ;;  %v1206_v8 = vld [vmem:[%s450_s24] ss:$0 sm:$0xff]  ;;  %s458_s13 = scalar_lea.vmem %s1629_s5, %s1500_s12  ;;  %s1212_s16 = sshll.u32 %s1397_s27, 4 }
  0x1c   : > { %1276 = vmatmul.mubr.msk.bf16.vlgmr.msra.gmra.mrb[0].mxu0 %vm493_vm2, %v484_v5  ;;  %1281 = vmatprep.subr.bf16.mxu1 %v1415_v0  ;;  %v1208_v18 = vld [vmem:[%s458_s13] ss:$0 sm:$0xff]  ;;  %s614_s17 = scalar_lea.vmem [#allocation2], %s1212_s16 }
  0x1f   : > { %1282 = vmatpush3.bf16.msra.mxu1 %v1354_v7 }
  0xef   : > { %v535_v9 = vpop.f32.mrb[0].mxu0 }
  0xf0   : > { %v536_v10 = vadd.f32 %v1206_v8, %v535_v9  ;;  %v1277_v11 = vpop.f32.mrb[1].mxu0 }
  0xf1   : > { %v538_v12 = vpop.f32.mrb[2].mxu0 }
  0xf2   : > { %v539_v13 = vadd.f32 %v1206_v8, %v538_v12  ;;  %v1278_v14 = vpop.f32.mrb[3].mxu0  ;;  %v542_v15 = vmax.f32 %v536_v10, 0.0 }
  0xf4   : > { %v543_v16 = vmax.f32 %v539_v13, 0.0 }
  0xf6   : > { %v544_v17 = vpack.c.bf16 %v543_v16, %v542_v15 }
  0xf8   : > { %1284 = vmatmul.mubr.msk.bf16.vlgmr.msra.gmra.mrb[0].mxu1 %vm568_vm3, %v544_v17 }
 0x1ca   : > { %621 = sbr.rel (%p1213_p7) target bundleno = 465 (0x1d1), region = 60 }
 0x1cb   : > { %v606_v19 = vpop.f32.mrb[0].mxu1 }
 0x1cc   : > { %v607_v20 = vadd.f32 %v1208_v18, %v606_v19  ;;  %v1285_v21 = vpop.f32.mrb[1].mxu1 }
 0x1cd   : > { %v609_v22 = vpop.f32.mrb[2].mxu1 }
 0x1ce   : > { %616 = vst.msk [vmem:[%s614_s17] sm:$0xff] %vm615_vm4, %v607_v20  ;;  %v610_v23 = vadd.f32 %v1208_v18, %v609_v22  ;;  %v1286_v24 = vpop.f32.mrb[3].mxu1 }
 0x1d0   : > { %617 = vst.msk [vmem:[%s614_s17 + $0x8] sm:$0xff] %vm615_vm4, %v610_v23 }
 0x1d1 PF: > { %v1214_v28 = vld [vmem:[%s434_s19] ss:$0 sm:$0xff]  ;;  %v632_v29 = vlaneseq  ;;  %vm688_vm5 = vcmask 130048   ;;  %v1418_v51 = vmov 32   ;;  %v1358_v5 = vld [vmem:[%s1535_s29 + $0x8] sm:$0xff]   ;;  %p1235_p8 = scmp.ne.s32.totalorder %s1397_s27, 1 }
 0x1d2   : > { %1356 = vset.pattern.permute.xlu1 %v1418_v51  ;;  %1355 = vset.pattern.permute.xlu0 %v1418_v51  ;;  %v1357_v3 = vld [vmem:[%s1535_s29] sm:$0xff]   ;;  %vm1003_vm14 = vcmask (!%p1235_p8), 257024  }
 0x1d3   : > { %v633_v31 = vshrl.u32 %v632_v29, 7  ;;  %1297 = vmatprep.subr.bf16.mxu1 %v1357_v3 }
 0x1d4   : > { %1298 = vmatpush3.bf16.msra.mxu1 %v1357_v3 }
 0x1d5   : > { %v685_v26 = vld [vmem:[%s614_s17] sm:$0xff]  ;;  %v634_v32 = vadd.s32 8, %v633_v31  ;;  %vm655_vm6 = vcmp.eq.s32.totalorder %v633_v31, %v1214_v28  ;;  %v635_v33 = vadd.s32 16, %v633_v31  ;;  %v636_v34 = vadd.s32 24, %v633_v31  ;;  %1299 = vmatprep.subr.bf16.mxu1 %v1358_v5 }
 0x1d6   : > { %v1215_v35 = vsel %vm655_vm6, 1.0, %v1415_v0  ;;  %v637_v36 = vadd.s32 32, %v633_v31  ;;  %v638_v37 = vadd.s32 40, %v633_v31  ;;  %v639_v38 = vadd.s32 48, %v633_v31 }
 0x1d7   : > { %v686_v27 = vld [vmem:[%s614_s17 + $0x8] sm:$0xff]  ;;  %vm656_vm7 = vcmp.eq.s32.totalorder %v634_v32, %v1214_v28  ;;  %vm657_vm8 = vcmp.eq.s32.totalorder %v635_v33, %v1214_v28  ;;  %vm658_vm9 = vcmp.eq.s32.totalorder %v636_v34, %v1214_v28  ;;  %v640_v39 = vadd.s32 56, %v633_v31  ;;  %v1228_v34 = vld [vmem:[%s466_s30] ss:$0 sm:$0xff] }
 0x1d8   : > { %v687_v30 = vpack.c.bf16 %v686_v27, %v685_v26  ;;  %v1216_v40 = vsel %vm656_vm7, 1.0, %v1415_v0  ;;  %v1217_v41 = vsel %vm657_vm8, 1.0, %v1415_v0  ;;  %v1218_v42 = vsel %vm658_vm9, 1.0, %v1415_v0  ;;  %1300 = vmatpush3.bf16.msra.mxu1 %v1358_v5 }
 0x1d9   : > { %vm659_vm10 = vcmp.eq.s32.totalorder %v637_v36, %v1214_v28  ;;  %v679_v43 = vpack.c.bf16 %v1216_v40, %v1215_v35  ;;  %v680_v44 = vpack.c.bf16 %v1218_v42, %v1217_v41  ;;  %vm660_vm11 = vcmp.eq.s32.totalorder %v638_v37, %v1214_v28  ;;  %v937_v36 = vld [vmem:[#allocation3 + $0x10] sm:$0xff]  ;;  %v938_v42 = vld [vmem:[#allocation3 + $0x18] sm:$0xff] }
 0x1da   : > { %1287 = vmatprep.subr.bf16.mxu0 %v687_v30  ;;  %v1219_v45 = vsel %vm659_vm10, 1.0, %v1415_v0  ;;  %v1220_v46 = vsel %vm660_vm11, 1.0, %v1415_v0  ;;  %vm661_vm12 = vcmp.eq.s32.totalorder %v639_v38, %v1214_v28  ;;  %vm662_vm13 = vcmp.eq.s32.totalorder %v640_v39, %v1214_v28  ;;  %v935_v39 = vld [vmem:[#allocation3] sm:$0xff] }
 0x1db   : > { %1288 = vmatpush3.bf16.msra.mxu0 %v687_v30  ;;  %1289 = vmatprep.mubr.msk.bf16.mxu0 %vm688_vm5, %v679_v43  ;;  %v681_v47 = vpack.c.bf16 %v1220_v46, %v1219_v45  ;;  %v1221_v48 = vsel %vm661_vm12, 1.0, %v1415_v0  ;;  %v1222_v49 = vsel %vm662_vm13, 1.0, %v1415_v0  ;;  %v936_v46 = vld [vmem:[#allocation3 + $0x8] sm:$0xff] }
 0x1dc   : > { %v682_v50 = vpack.c.bf16 %v1222_v49, %v1221_v48 }
 0x1de   : > { %1290 = vmatmul.mubr.msk.bf16.vlgmr.msra.gmra.mrb[4].mxu0 %vm688_vm5, %v680_v44 }
 0x1df   : > { %1293 = vmatprep.mubr.msk.bf16.mxu0 %vm688_vm5, %v681_v47 }
 0x1e6   : > { %1294 = vmatmul.mubr.msk.bf16.gmra.mrb[8].mxu0 %vm688_vm5, %v682_v50 }
 0x2b1   : > { %v1291_v52 = vpop.f32.mrb[4].mxu0 }
 0x2b2   : > { %v735_v53 = vpop.f32.mrb[5].mxu0  ;;  %v768_v54 = vmax.f32 %v1291_v52, 1.0 }
 0x2b3   : > { %v1292_v55 = vpop.f32.mrb[6].mxu0  ;;  %v766_v56 = vmax.f32 %v735_v53, 1.0 }
 0x2b4   : > { %786 = vperm.xlu1 %1356, %v768_v54   ;;  %v738_v57 = vpop.f32.mrb[7].mxu0  ;;  %v769_v58 = vmax.f32 %v1292_v55, 1.0 }
 0x2b5   : > { %776 = vperm.xlu0 %1355, %v766_v56   ;;  %v767_v59 = vmax.f32 %v738_v57, 1.0 }
 0x2b8   : > { %791 = vperm.xlu1 %1356, %v769_v58   ;;  %v942_v58 = vld [vmem:[#allocation3 + $0x38] sm:$0xff] }
 0x2b9   : > { %781 = vperm.xlu0 %1355, %v767_v59   ;;  %v1295_v60 = vpop.f32.mrb[8].mxu0 }
 0x2ba   : > { %v751_v61 = vpop.f32.mrb[9].mxu0  ;;  %v772_v2 = vmax.f32 %v1295_v60, 1.0 }
 0x2bb   : > { %v770_v62 = vmax.f32 %v751_v61, 1.0  ;;  %v1296_v63 = vpop.f32.mrb[10].mxu0 }
 0x2bc   : > { %v754_v0 = vpop.f32.mrb[11].mxu0  ;;  %v773_v4 = vmax.f32 %v1296_v63, 1.0 }
 0x2bd   : > { %v771_v1 = vmax.f32 %v754_v0, 1.0  ;;  %796 = vperm.xlu0 %1355, %v770_v62   ;;  %v940_v62 = vld [vmem:[#allocation3 + $0x28] sm:$0xff] }
 0x2bf   : > { %801 = vperm.xlu1 %1356, %v771_v1  }
 0x2c1   : > { %806 = vperm.xlu0 %1355, %v772_v2  }
 0x2c3   : > { %811 = vperm.xlu1 %1356, %v773_v4  }
 0x333   : > { %v787_v6 = vpop.permute.xlu1 %786 }
 0x334   : > { %v777_v7 = vpop.permute.xlu0 %776  ;;  %1359 = vrcp.f32 %v787_v6 }
 0x335   : > { %1361 = vrcp.f32 %v777_v7 }
 0x337   : > { %v792_v8 = vpop.permute.xlu1 %791 }
 0x338   : > { %1363 = vrcp.f32 %v792_v8  ;;  %v782_v9 = vpop.permute.xlu0 %781 }
 0x339   : > { %1365 = vrcp.f32 %v782_v9 }
 0x33c   : > { %v797_v10 = vpop.permute.xlu0 %796 }
 0x33d   : > { %1367 = vrcp.f32 %v797_v10 }
 0x33e   : > { %v802_v11 = vpop.permute.xlu1 %801  ;;  %v1360_v12 = vpop.eup %1359 }
 0x33f   : > { %1369 = vrcp.f32 %v802_v11  ;;  %v1362_v14 = vpop.eup %1361  ;;  %v819_v18 = vmul.f32 %v1360_v12, %v1291_v52  ;;  %v941_v52 = vld [vmem:[#allocation3 + $0x30] sm:$0xff] }
 0x340   : > { %v807_v13 = vpop.permute.xlu0 %806  ;;  %v815_v20 = vmul.f32 %v1362_v14, %v735_v53 }
 0x341   : > { %1371 = vrcp.f32 %v807_v13 }
 0x342   : > { %v1364_v15 = vpop.eup %1363  ;;  %v812_v16 = vpop.permute.xlu1 %811 }
 0x343   : > { %v1366_v17 = vpop.eup %1365  ;;  %1373 = vrcp.f32 %v812_v16  ;;  %v821_v19 = vmul.f32 %v1364_v15, %v1292_v55  ;;  %v939_v55 = vld [vmem:[#allocation3 + $0x20] sm:$0xff] }
 0x344   : > { %v817_v21 = vmul.f32 %v1366_v17, %v738_v57 }
 0x345   : > { %v831_v22 = vpack.c.bf16 %v821_v19, %v819_v18 }
 0x346   : > { %v830_v23 = vpack.c.bf16 %v817_v21, %v815_v20 }
 0x347   : > { %v1368_v24 = vpop.eup %1367 }
 0x348   : > { %1301 = vmatprep.mubr.msk.bf16.mxu1 %vm568_vm3, %v830_v23  ;;  %v823_v26 = vmul.f32 %v1368_v24, %v751_v61 }
 0x349   : > { %v1370_v25 = vpop.eup %1369  ;;  %1302 = vmatmul.mubr.msk.bf16.vlgmr.msra.gmra.mrb[4].mxu1 %vm568_vm3, %v831_v22 }
 0x34a   : > { %v825_v27 = vmul.f32 %v1370_v25, %v754_v0 }
 0x34b   : > { %v1372_v28 = vpop.eup %1371 }
 0x34c   : > { %v832_v29 = vpack.c.bf16 %v825_v27, %v823_v26  ;;  %v827_v31 = vmul.f32 %v1372_v28, %v1295_v60 }
 0x34d   : > { %v1374_v30 = vpop.eup %1373 }
 0x34e   : > { %1305 = vmatprep.mubr.msk.bf16.mxu1 %vm568_vm3, %v832_v29  ;;  %v829_v32 = vmul.f32 %v1374_v30, %v1296_v63 }
 0x350   : > { %v833_v33 = vpack.c.bf16 %v829_v32, %v827_v31 }
 0x352   : > { %1306 = vmatmul.mubr.msk.bf16.gmra.mrb[8].mxu1 %vm568_vm3, %v833_v33 }
 0x41c   : > { %v1303_v35 = vpop.f32.mrb[4].mxu1 }
 0x41d   : > { %v913_v37 = vadd.f32 %v1303_v35, %v1228_v34  ;;  %v904_v38 = vpop.f32.mrb[5].mxu1 }
 0x41e   : > { %v905_v40 = vadd.f32 %v1228_v34, %v904_v38  ;;  %v1304_v41 = vpop.f32.mrb[6].mxu1 }
 0x41f   : > { %v945_v43 = vadd.f32 %v937_v36, %v913_v37  ;;  %v916_v44 = vadd.f32 %v1304_v41, %v1228_v34  ;;  %v907_v45 = vpop.f32.mrb[7].mxu1 }
 0x420   : > { %v943_v47 = vadd.f32 %v935_v39, %v905_v40  ;;  %v908_v48 = vadd.f32 %v1228_v34, %v907_v45 }
 0x421   : > { %953 = vst.msk [vmem:[#allocation3 + $0x10] sm:$0xff] %vm568_vm3, %v945_v43  ;;  %v946_v49 = vadd.f32 %v938_v42, %v916_v44 }
 0x422   : > { %951 = vst.msk [vmem:[#allocation3] sm:$0xff] %vm568_vm3, %v943_v47  ;;  %v944_v50 = vadd.f32 %v936_v46, %v908_v48 }
 0x423   : > { %954 = vst.msk [vmem:[#allocation3 + $0x18] sm:$0xff] %vm568_vm3, %v946_v49 }
 0x424   : > { %952 = vst.msk [vmem:[#allocation3 + $0x8] sm:$0xff] %vm568_vm3, %v944_v50 }
 0x425   : > { %v1307_v51 = vpop.f32.mrb[8].mxu1 }
 0x426   : > { %v929_v53 = vadd.f32 %v1307_v51, %v1228_v34  ;;  %v920_v54 = vpop.f32.mrb[9].mxu1 }
 0x427   : > { %v921_v56 = vadd.f32 %v1228_v34, %v920_v54  ;;  %v1308_v57 = vpop.f32.mrb[10].mxu1  ;;  %962 = sbr.rel (%p1235_p8) target bundleno = 1080 (0x438), region = 64 }
 0x428   : > { %v949_v59 = vadd.f32 %v941_v52, %v929_v53  ;;  %v932_v60 = vadd.f32 %v1308_v57, %v1228_v34  ;;  %v923_v61 = vpop.f32.mrb[11].mxu1  ;;  %v965_v5 = vld [vmem:[#allocation3 + $0x10] sm:$0xff] (!%p1235_p8) }
 0x429   : > { %v947_v63 = vadd.f32 %v939_v55, %v921_v56  ;;  %v924_v0 = vadd.f32 %v1228_v34, %v923_v61  ;;  %v963_v3 = vld [vmem:[#allocation3] sm:$0xff] (!%p1235_p8)  ;;  %v1251_v8 = vpack.c.bf16 (!%p1235_p8), %v965_v5, %v965_v5 }
 0x42a   : > { %957 = vst.msk [vmem:[#allocation3 + $0x30] sm:$0xff] %vm568_vm3, %v949_v59  ;;  %v950_v1 = vadd.f32 %v942_v58, %v932_v60  ;;  %v1249_v6 = vpack.c.bf16 (!%p1235_p8), %v963_v3, %v963_v3  ;;  %v966_v9 = vld [vmem:[#allocation3 + $0x18] sm:$0xff] (!%p1235_p8) }
 0x42b   : > { %955 = vst.msk [vmem:[#allocation3 + $0x20] sm:$0xff] %vm568_vm3, %v947_v63  ;;  %v948_v2 = vadd.f32 %v940_v62, %v924_v0  ;;  %v964_v4 = vld [vmem:[#allocation3 + $0x8] sm:$0xff] (!%p1235_p8)  ;;  %v1252_v12 = vpack.c.bf16 (!%p1235_p8), %v966_v9, %v966_v9 }
 0x42c   : > { %958 = vst.msk [vmem:[#allocation3 + $0x38] sm:$0xff] %vm568_vm3, %v950_v1  ;;  %v1250_v7 = vpack.c.bf16 (!%p1235_p8), %v964_v4, %v964_v4 }
 0x42d   : > { %956 = vst.msk [vmem:[#allocation3 + $0x28] sm:$0xff] %vm568_vm3, %v948_v2 }
 0x42e   : > { %1004 = vst.msk [vmem:[%s1525_s18] sm:$0xf] %vm1003_vm14, %v1249_v6  ;;  %1005 = vst.msk [vmem:[%s1525_s18 + $0x4] sm:$0xf] %vm1003_vm14, %v1250_v7 }
 0x42f   : > { %1006 = vst.msk [vmem:[%s1525_s18 + $0x8] sm:$0xf] %vm1003_vm14, %v1251_v8  ;;  %1007 = vst.msk [vmem:[%s1525_s18 + $0xc] sm:$0xf] %vm1003_vm14, %v1252_v12 }
 0x431   : > { %v969_v15 = vld [vmem:[#allocation3 + $0x30] sm:$0xff] }
 0x432   : > { %v967_v10 = vld [vmem:[#allocation3 + $0x20] sm:$0xff]  ;;  %v1255_v17 = vpack.c.bf16 %v969_v15, %v969_v15 }
 0x433   : > { %v1253_v13 = vpack.c.bf16 %v967_v10, %v967_v10  ;;  %v970_v16 = vld [vmem:[#allocation3 + $0x38] sm:$0xff] }
 0x434   : > { %v968_v11 = vld [vmem:[#allocation3 + $0x28] sm:$0xff]  ;;  %v1256_v18 = vpack.c.bf16 %v970_v16, %v970_v16  ;;  %1010 = vst.msk [vmem:[%s1525_s18 + $0x18] sm:$0xf] %vm1003_vm14, %v1255_v17 }
 0x435   : > { %v1254_v14 = vpack.c.bf16 %v968_v11, %v968_v11  ;;  %1008 = vst.msk [vmem:[%s1525_s18 + $0x10] sm:$0xf] %vm1003_vm14, %v1253_v13 }
 0x436   : > { %1011 = vst.msk [vmem:[%s1525_s18 + $0x1c] sm:$0xf] %vm1003_vm14, %v1256_v18 }
 0x437   : > { %1009 = vst.msk [vmem:[%s1525_s18 + $0x14] sm:$0xf] %vm1003_vm14, %v1254_v14 }
 0x438 PF: > { %s18_s9 = sadd.s32 1, %s1413_s9   ;;  %s1639_s27 = sld [smem:[#allocation4_spill]] }
 0x439   : > { %p15_p9 = scmp.ge.s32.totalorder %s18_s9, 6   ;;  %s1640_s28 = sld [smem:[#allocation5_spill]] }
 0x43a   : > { %s1641_s29 = sld [smem:[#allocation6_spill]]  ;;  %s1642_s30 = sld [smem:[#allocation7_spill]] }
 0x43b   :  { %17 = sbr.rel (!%p15_p9) target bundleno = 3 (0x3), region = 117 }

// kernel: _lambda_.8
= control target key start
LH: loop header
LB: loop body
LE: loop exit
PB: predicated region body
PF: predicated region fallthrough
CT: control target
= control target key end

     0   :  { %s1246_s15 = smov 0   ;;  %s1248_s16 = smov 0   ;;  %s1392_s0 = inlined_call_operand.vmem [shape: bf16[2,64,32], index: 0, kind: input, shape index: {}, may-alias: {0,1}]   ;;  %s1393_s1 = inlined_call_operand.vmem [shape: bf16[2,64,32], index: 1, kind: input, shape index: {}, may-alias: {0,1}]   ;;  %s1394_s2 = inlined_call_operand.vmem [shape: bf16[32,96], index: 2, kind: input, shape index: {}]   ;;  %s1395_s3 = inlined_call_operand.vmem [shape: bf16[32,32], index: 3, kind: input, shape index: {}]   ;;  %s1396_s4 = inlined_call_operand.vmem [shape: bf16[2,64,32], index: 4, kind: output, shape index: {}]  }
   0x1   :  { %s1250_s17 = smov 0  }
   0x2 LB: > { %s26_s18 = sadd.s32 1, %s1213_s16  ;;  %p970_p0 = scmp.ge.s32.totalorder %s1217_s17, 1  ;;  %s1217_s17 = sphi %s1250_s17, %s14_s17   ;;  %s1213_s16 = sphi %s1248_s16, %s1398_s16   ;;  %s1209_s15 = sphi %s1246_s15, %s1397_s15  }
   0x3   : > { %p28_p1 = scmp.ge.s32.totalorder %s26_s18, 2  ;;  %p193_p2 = scmp.lt.s32.totalorder %s1217_s17, 3 }
   0x5   : > { %s1400_s18 = smov (%p28_p1, %s26_s18), 0  ;;  %p194_p3 = pnand %p970_p0, %p193_p2 }
   0x6   : > { %v1155_v0 = vld [vmem:[%s1394_s2] sm:$0xff] (!%p194_p3)   ;;  %p233_p4 = scmp.lt.s32.totalorder (!%p194_p3), %s1209_s15, 1  ;;  %v1156_v1 = vld [vmem:[%s1394_s2 + $0x8] sm:$0xff] (!%p194_p3)   ;;  %vm306_vm0 = vcmask (!%p194_p3), 261120   ;;  %vm384_vm1 = vcmask (!%p194_p3), 785408   ;;  %s1219_s27 = smov (!%p194_p3), 96  }
   0x7   : > { %197 = sbr.rel (%p194_p3) target bundleno = 1387 (0x56b), region = 36  ;;  %1069 = vmatprep.subr.bf16.mxu0 (!%p194_p3), %v1155_v0  ;;  %vm521_vm2 = vcmask (!%p194_p3), 523264   ;;  %s1220_s28 = smov (!%p194_p3), 64   ;;  %vm856_vm3 = vcmask (!%p194_p3), 257024  }
   0x8   : > { %1070 = vmatpush3.bf16.msra.mxu0 (!%p194_p3), %v1155_v0 }
   0x9   : > { %1071 = vmatprep.subr.bf16.mxu0 (!%p194_p3), %v1156_v1 }
   0xc   : > { %1072 = vmatpush3.bf16.msra.mxu0 (!%p194_p3), %v1156_v1 }
   0xe   : > { %s1402_s15 = smov (!%p233_p4, %s1209_s15), 1 }
   0xf   : > { %s1270_s23 = sshll.u32 %s1402_s15, 5 }
  0x10   : > { %s246_s26 = scalar_lea.vmem %s1393_s1, %s1270_s23  ;;  %s240_s9 = scalar_lea.vmem %s1392_s0, %s1270_s23 }
  0x11   : > { %v1157_v2 = vld [vmem:[%s246_s26] sm:$0xff]   ;;  %v1158_v3 = vld [vmem:[%s246_s26 + $0x8] sm:$0xff]   ;;  %v1159_v4 = vld [vmem:[%s246_s26 + $0x10] sm:$0xff]   ;;  %s1365_s12 = scalar_lea.vmem %s1396_s4, %s1270_s23 }
  0x12   : > { %1073 = vmatprep.mubr.msk.bf16.mxu0 %vm306_vm0, %v1157_v2  ;;  %v1160_v5 = vld [vmem:[%s246_s26 + $0x18] sm:$0xff]  }
  0x13   : > { %1074 = vmatmul.mubr.msk.bf16.vlgmr.msra.gmra.mrb[0].mxu0 %vm306_vm0, %v1158_v3 }
  0x14   : > { %1077 = vmatprep.mubr.msk.bf16.mxu0 %vm306_vm0, %v1159_v4 }
  0x1b   : > { %1078 = vmatmul.mubr.msk.bf16.gmra.mrb[4].mxu0 %vm306_vm0, %v1160_v5 }
  0xe6   : > { %v1075_v6 = vpop.f32.mrb[0].mxu0 }
  0xe7   : > { %387 = vst.msk [vmem:[#allocation2 + $0x10] sm:$0xff] %vm384_vm1, %v1075_v6  ;;  %v353_v7 = vpop.f32.mrb[1].mxu0 }
  0xe8   : > { %385 = vst.msk [vmem:[#allocation2] sm:$0xff] %vm384_vm1, %v353_v7  ;;  %v1076_v8 = vpop.f32.mrb[2].mxu0 }
  0xe9   : > { %388 = vst.msk [vmem:[#allocation2 + $0x18] sm:$0xff] %vm384_vm1, %v1076_v8  ;;  %v356_v9 = vpop.f32.mrb[3].mxu0 }
  0xea   : > { %386 = vst.msk [vmem:[#allocation2 + $0x8] sm:$0xff] %vm384_vm1, %v356_v9 }
  0xee   : > { %v1079_v10 = vpop.f32.mrb[4].mxu0  ;;  %v405_v18 = vld [vmem:[#allocation2 + $0x10] sm:$0xff] }
  0xef   : > { %391 = vst.msk [vmem:[#allocation2 + $0x30] sm:$0xff] %vm384_vm1, %v1079_v10  ;;  %v369_v11 = vpop.f32.mrb[5].mxu0  ;;  %v403_v14 = vld [vmem:[#allocation2] sm:$0xff] }
  0xf0   : > { %389 = vst.msk [vmem:[#allocation2 + $0x20] sm:$0xff] %vm384_vm1, %v369_v11  ;;  %v1080_v12 = vpop.f32.mrb[6].mxu0  ;;  %v406_v17 = vld [vmem:[#allocation2 + $0x18] sm:$0xff] }
  0xf1   : > { %392 = vst.msk [vmem:[#allocation2 + $0x38] sm:$0xff] %vm384_vm1, %v1080_v12  ;;  %v372_v13 = vpop.f32.mrb[7].mxu0  ;;  %v404_v15 = vld [vmem:[#allocation2 + $0x8] sm:$0xff]  ;;  %v1289_v19 = vpack.c.bf16 %v406_v17, %v405_v18 }
  0xf2   : > { %390 = vst.msk [vmem:[#allocation2 + $0x28] sm:$0xff] %vm384_vm1, %v372_v13  ;;  %v415_v16 = vpack.c.bf16 %v404_v15, %v403_v14 }
  0xf4   : > { %423 = vrot.lane.b32.xlu0 %v415_v16, %s1219_s27  ;;  %1089 = vmatprep.mubr.msk.bf16.mxu1 %vm306_vm0, %v415_v16 }
  0xf6   : > { %v409_v22 = vld [vmem:[#allocation2 + $0x30] sm:$0xff] }
  0xf7   : > { %v407_v20 = vld [vmem:[#allocation2 + $0x20] sm:$0xff] }
  0xf8   : > { %425 = vrot.lane.b32.xlu0 %v1289_v19, %s1219_s27  ;;  %v410_v23 = vld [vmem:[#allocation2 + $0x38] sm:$0xff] }
  0xf9   : > { %v408_v21 = vld [vmem:[#allocation2 + $0x28] sm:$0xff]  ;;  %v1295_v25 = vpack.c.bf16 %v410_v23, %v409_v22 }
  0xfa   : > { %v1292_v24 = vpack.c.bf16 %v408_v21, %v407_v20 }
  0xfc   : > { %427 = vrot.lane.b32.xlu1 %v1292_v24, %s1219_s27 }
 0x100   : > { %429 = vrot.lane.b32.xlu1 %v1295_v25, %s1219_s27 }
 0x166   : > { %v424_v26 = vpop.permute.xlu0 %423 }
 0x167   : > { %1125 = vmatprep.subr.msk.bf16.mxu1 %vm306_vm0, %v424_v26  ;;  %v445_v27 = vsel %vm306_vm0, %v424_v26, 0 }
 0x168   : > { %1082 = vmatpush3.bf16.xpose.msra.mxu1 %v445_v27 }
 0x16a   : > { %v426_v28 = vpop.permute.xlu0 %425 }
 0x16b   : > { %1126 = vmatprep.subr.msk.bf16.mxu1 %vm306_vm0, %v426_v28  ;;  %v448_v29 = vsel %vm306_vm0, %v426_v28, 0 }
 0x16e   : > { %v428_v30 = vpop.permute.xlu1 %427 }
 0x16f   : > { %v451_v31 = vsel %vm306_vm0, %v428_v30, 0 }
 0x170   : > { %1084 = vmatpush3.bf16.xpose.msra.mxu1 %v448_v29 }
 0x171   : > { %1127 = vmatprep.subr.msk.bf16.mxu1 %vm306_vm0, %v428_v30 }
 0x172   : > { %v430_v32 = vpop.permute.xlu1 %429 }
 0x173   : > { %v454_v33 = vsel %vm306_vm0, %v430_v32, 0 }
 0x178   : > { %1086 = vmatpush3.bf16.xpose.msra.mxu1 %v451_v31 }
 0x179   : > { %1128 = vmatprep.subr.msk.bf16.mxu1 %vm306_vm0, %v430_v32 }
 0x180   : > { %1088 = vmatpush3.bf16.xpose.msra.mxu1 %v454_v33 }
 0x187   : > { %1090 = vmatmul.mubr.msk.bf16.vlgmr.msra.gmra.mrb[0].mxu1 %vm306_vm0, %v1289_v19 }
 0x188   : > { %1093 = vmatprep.mubr.msk.bf16.mxu1 %vm306_vm0, %v1292_v24 }
 0x18f   : > { %1094 = vmatmul.mubr.msk.bf16.gmra.mrb[4].mxu1 %vm306_vm0, %v1295_v25 }
 0x25a   : > { %v1091_v34 = vpop.f32.mrb[0].mxu1 }
 0x25b   : > { %v490_v35 = vpop.f32.mrb[1].mxu1  ;;  %v528_v40 = vsel %vm521_vm2, %v1091_v34, -inf }
 0x25c   : > { %v1092_v36 = vpop.f32.mrb[2].mxu1  ;;  %v522_v37 = vsel %vm521_vm2, %v490_v35, -inf }
 0x25d   : > { %523 = vmax.xlane.f32.xlu0 %v522_v37  ;;  %v493_v38 = vpop.f32.mrb[3].mxu1  ;;  %v531_v44 = vsel %vm521_vm2, %v1092_v36, -inf }
 0x25e   : > { %v525_v39 = vsel %vm521_vm2, %v493_v38, -inf }
 0x25f   : > { %526 = vmax.xlane.f32.xlu1 %v525_v39 }
 0x261   : > { %529 = vmax.xlane.f32.xlu0 %v528_v40 }
 0x262   : > { %v1095_v41 = vpop.f32.mrb[4].mxu1 }
 0x263   : > { %v506_v42 = vpop.f32.mrb[5].mxu1  ;;  %v540_v47 = vsel %vm521_vm2, %v1095_v41, -inf }
 0x264   : > { %v1096_v43 = vpop.f32.mrb[6].mxu1  ;;  %v534_v45 = vsel %vm521_vm2, %v506_v42, -inf }
 0x265   : > { %532 = vmax.xlane.f32.xlu0 %v531_v44  ;;  %535 = vmax.xlane.f32.xlu1 %v534_v45  ;;  %v509_v46 = vpop.f32.mrb[7].mxu1  ;;  %v543_v49 = vsel %vm521_vm2, %v1096_v43, -inf }
 0x266   : > { %v537_v48 = vsel %vm521_vm2, %v509_v46, -inf }
 0x269   : > { %541 = vmax.xlane.f32.xlu1 %v540_v47  ;;  %538 = vmax.xlane.f32.xlu0 %v537_v48  ;;  %v1161_v48 = vld [vmem:[%s1395_s3] sm:$0xff]  }
 0x26d   : > { %544 = vmax.xlane.f32.xlu0 %v543_v49 }
 0x27a   : > { %614 = vrot.lane.b32.xlu1 %v415_v16, %s1220_s28 }
 0x2ea   : > { %v524_v50 = vpop.xlane.xlu0 %523 }
 0x2eb   : > { %v546_v51 = vsub.f32 %v490_v35, %v524_v50 }
 0x2ec   : > { %v527_v52 = vpop.xlane.xlu1 %526 }
 0x2ed   : > { %v554_v55 = vmul.f32 1.442695, %v546_v51  ;;  %v547_v56 = vsub.f32 %v493_v38, %v527_v52 }
 0x2ee   : > { %v530_v53 = vpop.xlane.xlu0 %529 }
 0x2ef   : > { %v548_v54 = vsub.f32 %v1091_v34, %v530_v53  ;;  %v556_v61 = vmul.f32 1.442695, %v547_v56  ;;  %v1162_v53 = vld [vmem:[%s1395_s3 + $0x8] sm:$0xff]  }
 0x2f1   : > { %v558_v57 = vmul.f32 1.442695, %v548_v54 }
 0x2f2   : > { %v533_v58 = vpop.xlane.xlu0 %532  ;;  %v536_v59 = vpop.xlane.xlu1 %535 }
 0x2f3   : > { %1163 = vpow2.f32 %v558_v57  ;;  %v549_v60 = vsub.f32 %v1092_v36, %v533_v58  ;;  %v550_v63 = vsub.f32 %v506_v42, %v536_v59 }
 0x2f4   : > { %1165 = vpow2.f32 %v554_v55 }
 0x2f5   : > { %v560_v62 = vmul.f32 1.442695, %v549_v60  ;;  %v562_v3 = vmul.f32 1.442695, %v550_v63 }
 0x2f6   : > { %v542_v0 = vpop.xlane.xlu1 %541  ;;  %v539_v1 = vpop.xlane.xlu0 %538 }
 0x2f7   : > { %1167 = vpow2.f32 %v560_v62  ;;  %v552_v2 = vsub.f32 %v1095_v41, %v542_v0  ;;  %v551_v5 = vsub.f32 %v509_v46, %v539_v1 }
 0x2f8   : > { %1169 = vpow2.f32 %v556_v61 }
 0x2f9   : > { %v566_v4 = vmul.f32 1.442695, %v552_v2  ;;  %v564_v10 = vmul.f32 1.442695, %v551_v5 }
 0x2fa   : > { %v615_v6 = vpop.permute.xlu1 %614  ;;  %v545_v7 = vpop.xlane.xlu0 %544 }
 0x2fb   : > { %1171 = vpow2.f32 %v566_v4  ;;  %v553_v8 = vsub.f32 %v1096_v43, %v545_v7  ;;  %1097 = vmatprep.subr.bf16.mxu0 %v615_v6 }
 0x2fc   : > { %1098 = vmatpush3.bf16.msra.mxu0 %v615_v6  ;;  %1173 = vpow2.f32 %v562_v3 }
 0x2fd   : > { %v1321_v9 = vpop.eup %1163  ;;  %v568_v11 = vmul.f32 1.442695, %v553_v8  ;;  %v1038_v8 = vld [vmem:[%s240_s9 + $0x8] sm:$0xff]  }
 0x2fe   : > { %v576_v12 = vsel %vm521_vm2, %v1321_v9, 0.0  ;;  %v1166_v13 = vpop.eup %1165 }
 0x2ff   : > { %1175 = vpow2.f32 %v568_v11  ;;  %577 = vadd.xlane.f32.xlu1 %v576_v12  ;;  %v570_v15 = vsel %vm521_vm2, %v1166_v13, 0.0  ;;  %v1029_v12 = vunpack.c.h.bf16 %v1038_v8 }
 0x300   : > { %1177 = vpow2.f32 %v564_v10  ;;  %v1028_v10 = vunpack.c.l.bf16 %v1038_v8 }
 0x301   : > { %v1168_v14 = vpop.eup %1167 }
 0x302   : > { %v579_v16 = vsel %vm521_vm2, %v1168_v14, 0.0  ;;  %v1170_v17 = vpop.eup %1169 }
 0x303   : > { %571 = vadd.xlane.f32.xlu1 %v570_v15  ;;  %580 = vadd.xlane.f32.xlu0 %v579_v16  ;;  %v573_v21 = vsel %vm521_vm2, %v1170_v17, 0.0 }
 0x305   : > { %v1327_v18 = vpop.eup %1171 }
 0x306   : > { %v588_v20 = vsel %vm521_vm2, %v1327_v18, 0.0  ;;  %v1174_v22 = vpop.eup %1173 }
 0x307   : > { %589 = vadd.xlane.f32.xlu1 %v588_v20  ;;  %574 = vadd.xlane.f32.xlu0 %v573_v21  ;;  %v582_v26 = vsel %vm521_vm2, %v1174_v22, 0.0  ;;  %v1040_v20 = vld [vmem:[%s240_s9 + $0x18] sm:$0xff]  }
 0x309   : > { %v1176_v23 = vpop.eup %1175 }
 0x30a   : > { %v591_v27 = vsel %vm521_vm2, %v1176_v23, 0.0  ;;  %v1178_v28 = vpop.eup %1177 }
 0x30b   : > { %583 = vadd.xlane.f32.xlu1 %v582_v26  ;;  %592 = vadd.xlane.f32.xlu0 %v591_v27  ;;  %v585_v29 = vsel %vm521_vm2, %v1178_v28, 0.0  ;;  %v1039_v26 = vld [vmem:[%s240_s9 + $0x10] sm:$0xff]  }
 0x30f   : > { %586 = vadd.xlane.f32.xlu0 %v585_v29 }
 0x31c   : > { %618 = vrot.lane.b32.xlu1 %v1292_v24, %s1220_s28 }
 0x320   : > { %620 = vrot.lane.b32.xlu1 %v1295_v25, %s1220_s28 }
 0x325   : > { %616 = vrot.lane.b32.xlu0 %v1289_v19, %s1220_s28 }
 0x38c   : > { %v578_v30 = vpop.xlane.xlu1 %577 }
 0x390   : > { %v572_v31 = vpop.xlane.xlu1 %571  ;;  %v581_v32 = vpop.xlane.xlu0 %580 }
 0x391   : > { %1179 = vrcp.f32 %v572_v31 }
 0x394   : > { %v590_v33 = vpop.xlane.xlu1 %589  ;;  %v575_v34 = vpop.xlane.xlu0 %574 }
 0x395   : > { %1181 = vrcp.f32 %v575_v34 }
 0x396   : > { %1183 = vrcp.f32 %v581_v32  ;;  %v1032_v32 = vunpack.c.l.bf16 %v1039_v26 }
 0x397   : > { %1185 = vrcp.f32 %v578_v30  ;;  %v1036_v30 = vunpack.c.l.bf16 %v1040_v20 }
 0x398   : > { %v593_v35 = vpop.xlane.xlu0 %592  ;;  %v584_v36 = vpop.xlane.xlu1 %583 }
 0x399   : > { %1187 = vrcp.f32 %v584_v36 }
 0x39b   : > { %v1180_v24 = vpop.eup %1179 }
 0x39c   : > { %v587_v37 = vpop.xlane.xlu0 %586  ;;  %v619_v25 = vpop.permute.xlu1 %618  ;;  %v602_v19 = vmul.f32 %v1180_v24, %v1166_v13 }
 0x39d   : > { %1189 = vrcp.f32 %v587_v37 }
 0x39e   : > { %1191 = vrcp.f32 %v593_v35  ;;  %v1033_v35 = vunpack.c.h.bf16 %v1039_v26 }
 0x39f   : > { %v1182_v38 = vpop.eup %1181  ;;  %1193 = vrcp.f32 %v590_v33  ;;  %v1037_v33 = vunpack.c.h.bf16 %v1040_v20 }
 0x3a0   : > { %v617_v39 = vpop.permute.xlu0 %616  ;;  %v603_v40 = vmul.f32 %v1182_v38, %v1170_v17  ;;  %v1184_v42 = vpop.eup %1183 }
 0x3a1   : > { %1099 = vmatprep.subr.bf16.mxu0 %v617_v39  ;;  %v1186_v43 = vpop.eup %1185  ;;  %v621_v45 = vpop.permute.xlu1 %620  ;;  %v605_v47 = vmul.f32 %v1184_v42, %v1168_v14 }
 0x3a2   : > { %1100 = vmatpush3.bf16.msra.mxu0 %v617_v39  ;;  %v610_v41 = vpack.c.bf16 %v603_v40, %v602_v19  ;;  %v604_v50 = vmul.f32 %v1186_v43, %v1321_v9  ;;  %v1023_v9 = vld [vmem:[%s240_s9] sm:$0xff]  }
 0x3a3   : > { %1101 = vmatprep.subr.bf16.mxu0 %v619_v25  ;;  %v1188_v44 = vpop.eup %1187  ;;  %v1024_v11 = vunpack.c.l.bf16 %v1023_v9  ;;  %v1025_v14 = vunpack.c.h.bf16 %v1023_v9 }
 0x3a4   : > { %1105 = vmatprep.mubr.msk.bf16.mxu0 %vm521_vm2, %v610_v41  ;;  %v606_v51 = vmul.f32 %v1188_v44, %v1174_v22  ;;  %v611_v52 = vpack.c.bf16 %v605_v47, %v604_v50 }
 0x3a6   : > { %1102 = vmatpush3.bf16.msra.mxu0 %v619_v25 }
 0x3a7   : > { %v1190_v46 = vpop.eup %1189  ;;  %1103 = vmatprep.subr.bf16.mxu0 %v621_v45 }
 0x3a8   : > { %v607_v49 = vmul.f32 %v1190_v46, %v1178_v28  ;;  %v1192_v54 = vpop.eup %1191 }
 0x3a9   : > { %v1194_v56 = vpop.eup %1193  ;;  %v609_v57 = vmul.f32 %v1192_v54, %v1176_v23 }
 0x3aa   : > { %1104 = vmatpush3.bf16.msra.mxu0 %v621_v45  ;;  %v612_v55 = vpack.c.bf16 %v607_v49, %v606_v51  ;;  %v608_v58 = vmul.f32 %v1194_v56, %v1327_v18 }
 0x3ab   : > { %1113 = vmatprep.subr.bf16.mxu0 %v1161_v48 }
 0x3ac   : > { %v613_v59 = vpack.c.bf16 %v609_v57, %v608_v58 }
 0x3ad   : > { %1106 = vmatmul.mubr.msk.bf16.vlgmr.msra.gmra.mrb[8].mxu0 %vm521_vm2, %v611_v52 }
 0x3ae   : > { %1109 = vmatprep.mubr.msk.bf16.mxu0 %vm521_vm2, %v612_v55  ;;  %1114 = vmatpush3.bf16.msra.mxu0 %v1161_v48 }
 0x3af   : > { %1115 = vmatprep.subr.bf16.mxu0 %v1162_v53 }
 0x3b2   : > { %1116 = vmatpush3.bf16.msra.mxu0 %v1162_v53 }
 0x3b5   : > { %1110 = vmatmul.mubr.msk.bf16.gmra.mrb[12].mxu0 %vm521_vm2, %v613_v59 }
 0x480   : > { %v1107_v60 = vpop.f32.mrb[8].mxu0 }
 0x481   : > { %v672_v61 = vpop.f32.mrb[9].mxu0 }
 0x482   : > { %v1108_v62 = vpop.f32.mrb[10].mxu0 }
 0x483   : > { %v704_v63 = vpack.c.bf16 %v1108_v62, %v1107_v60  ;;  %v675_v0 = vpop.f32.mrb[11].mxu0 }
 0x484   : > { %v703_v1 = vpack.c.bf16 %v675_v0, %v672_v61 }
 0x486   : > { %1117 = vmatprep.mubr.msk.bf16.mxu0 %vm306_vm0, %v703_v1 }
 0x487   : > { %1118 = vmatmul.mubr.msk.bf16.vlgmr.msra.gmra.mrb[16].mxu0 %vm306_vm0, %v704_v63 }
 0x488   : > { %v1111_v2 = vpop.f32.mrb[12].mxu0 }
 0x489   : > { %v688_v3 = vpop.f32.mrb[13].mxu0 }
 0x48a   : > { %v1112_v4 = vpop.f32.mrb[14].mxu0 }
 0x48b   : > { %v706_v5 = vpack.c.bf16 %v1112_v4, %v1111_v2  ;;  %v691_v6 = vpop.f32.mrb[15].mxu0 }
 0x48c   : > { %v705_v7 = vpack.c.bf16 %v691_v6, %v688_v3 }
 0x48e   : > { %1121 = vmatprep.mubr.msk.bf16.mxu0 %vm306_vm0, %v705_v7 }
 0x48f   : > { %1122 = vmatmul.mubr.msk.bf16.gmra.mrb[20].mxu0 %vm306_vm0, %v706_v5 }
 0x55a   : > { %v1119_v13 = vpop.f32.mrb[16].mxu0 }
 0x55b   : > { %v818_v15 = vadd.f32 %v1119_v13, %v1028_v10  ;;  %v769_v16 = vpop.f32.mrb[17].mxu0 }
 0x55c   : > { %v816_v17 = vadd.f32 %v1024_v11, %v769_v16  ;;  %v1120_v18 = vpop.f32.mrb[18].mxu0 }
 0x55d   : > { %v1016_v21 = vpack.c.bf16 %v818_v15, %v818_v15  ;;  %v819_v22 = vadd.f32 %v1120_v18, %v1029_v12  ;;  %v772_v23 = vpop.f32.mrb[19].mxu0 }
 0x55e   : > { %v1014_v27 = vpack.c.bf16 %v816_v17, %v816_v17  ;;  %v817_v28 = vadd.f32 %v1025_v14, %v772_v23 }
 0x55f   : > { %859 = vst.msk [vmem:[%s1365_s12 + $0x8] sm:$0xf] %vm856_vm3, %v1016_v21  ;;  %v1017_v29 = vpack.c.bf16 %v819_v22, %v819_v22 }
 0x560   : > { %857 = vst.msk [vmem:[%s1365_s12] sm:$0xf] %vm856_vm3, %v1014_v27  ;;  %v1015_v31 = vpack.c.bf16 %v817_v28, %v817_v28 }
 0x561   : > { %860 = vst.msk [vmem:[%s1365_s12 + $0xc] sm:$0xf] %vm856_vm3, %v1017_v29 }
 0x562   : > { %858 = vst.msk [vmem:[%s1365_s12 + $0x4] sm:$0xf] %vm856_vm3, %v1015_v31  ;;  %v1123_v34 = vpop.f32.mrb[20].mxu0 }
 0x563   : > { %v822_v36 = vadd.f32 %v1123_v34, %v1036_v30  ;;  %v785_v37 = vpop.f32.mrb[21].mxu0 }
 0x564   : > { %v820_v24 = vadd.f32 %v1032_v32, %v785_v37  ;;  %v1124_v38 = vpop.f32.mrb[22].mxu0 }
 0x565   : > { %v1020_v25 = vpack.c.bf16 %v822_v36, %v822_v36  ;;  %v823_v39 = vadd.f32 %v1124_v38, %v1037_v33  ;;  %v788_v19 = vpop.f32.mrb[23].mxu0 }
 0x566   : > { %v1018_v40 = vpack.c.bf16 %v820_v24, %v820_v24  ;;  %v821_v41 = vadd.f32 %v1033_v35, %v788_v19 }
 0x567   : > { %863 = vst.msk [vmem:[%s1365_s12 + $0x18] sm:$0xf] %vm856_vm3, %v1020_v25  ;;  %v1021_v42 = vpack.c.bf16 %v823_v39, %v823_v39 }
 0x568   : > { %861 = vst.msk [vmem:[%s1365_s12 + $0x10] sm:$0xf] %vm856_vm3, %v1018_v40  ;;  %v1019_v43 = vpack.c.bf16 %v821_v41, %v821_v41 }
 0x569   : > { %864 = vst.msk [vmem:[%s1365_s12 + $0x1c] sm:$0xf] %vm856_vm3, %v1021_v42 }
 0x56a   : > { %862 = vst.msk [vmem:[%s1365_s12 + $0x14] sm:$0xf] %vm856_vm3, %v1019_v43 }
 0x56b PF: > { %s14_s17 = sadd.s32 1, %s1217_s17   ;;  %s1397_s15 = smov %s1213_s16 }
 0x56c   : > { %p11_p5 = scmp.ge.s32.totalorder %s14_s17, 4   ;;  %s1398_s16 = smov %s1400_s18 }
 0x56e   :  { %13 = sbr.rel (!%p11_p5) target bundleno = 2 (0x2), region = 74 }

// kernel: _lambda_.11
= control target key start
LH: loop header
LB: loop body
LE: loop exit
PB: predicated region body
PF: predicated region fallthrough
CT: control target
= control target key end

     0   :  { %v282_v1 = vmov 0.0   ;;  %vm283_vm0 = vmmov 0   ;;  %vm52_vm1 = vcmask 261120   ;;  %s359_s0 = inlined_call_operand.vmem [shape: bf16[16,32], index: 0, kind: input, shape index: {}]   ;;  %s360_s1 = inlined_call_operand.vmem [shape: bf16[32,64], index: 1, kind: input, shape index: {}]   ;;  %s361_s2 = inlined_call_operand.vmem [shape: f32[1,64], index: 2, kind: input, shape index: {}]   ;;  %s362_s3 = inlined_call_operand.vmem [shape: bf16[64,32], index: 3, kind: input, shape index: {}]   ;;  %s363_s4 = inlined_call_operand.vmem [shape: f32[1,32], index: 4, kind: input, shape index: {}]   ;;  %s364_s5 = inlined_call_operand.hbm [shape: f32[16,32], index: 5, kind: output, shape index: {}]  }
   0x1   :  { %v250_v0 = vld [vmem:[%s360_s1] sm:$0xff]   ;;  %225 = vmatprep.subr.bf16.mxu0 %v282_v1  ;;  %v251_v2 = vld [vmem:[%s360_s1 + $0x8] sm:$0xff]   ;;  %233 = vmatprep.subr.bf16.mxu1 %v282_v1 }
   0x2   :  { %226 = vmatpush3.bf16.msra.mxu0 %v250_v0  ;;  %229 = vmatprep.mubr.msk.bf16.mxu0 %vm283_vm0, %v282_v1  ;;  %v22_v3 = vld [vmem:[%s359_s0] sm:$0xff]   ;;  %v254_v5 = vld [vmem:[%s362_s3 + $0x8] sm:$0xff]  }
   0x3   :  { %227 = vmatprep.subr.bf16.mxu0 %v282_v1  ;;  %v253_v4 = vld [vmem:[%s362_s3] sm:$0xff]   ;;  %241 = vmatprep.mubr.msk.bf16.mxu1 %vm283_vm0, %v282_v1 }
   0x4   :  { %234 = vmatpush3.bf16.msra.mxu1 %v253_v4 }
   0x5   :  { %235 = vmatprep.subr.bf16.mxu1 %v282_v1 }
   0x6   :  { %228 = vmatpush3.bf16.msra.mxu0 %v251_v2 }
   0x7   :  { %10 = vsyncpa [#allocation3], 0  ;;  %v255_v6 = vld [vmem:[%s362_s3 + $0x10] sm:$0xff]   ;;  %v256_v7 = vld [vmem:[%s362_s3 + $0x18] sm:$0xff]   ;;  %vm139_vm2 = vcmask 523264   ;;  %v184_v19 = vunpack.c.l.bf16 %v22_v3  ;;  %v185_v23 = vunpack.c.h.bf16 %v22_v3 }
   0x8   :  { %236 = vmatpush3.bf16.msra.mxu1 %v254_v5  ;;  %v206_v8 = vld [vmem:[%s361_s2] ss:$0 sm:$0xff]  ;;  %s284_s2 = smov [#allocation2]  }
   0x9   :  { %230 = vmatmul.mubr.msk.bf16.vlgmr.msra.gmra.mrb[0].mxu0 %vm52_vm1, %v22_v3  ;;  %237 = vmatprep.subr.bf16.mxu1 %v282_v1  ;;  %v211_v18 = vld [vmem:[%s363_s4] ss:$0 sm:$0xff]  ;;  %s195_s3 = sshll.u32 %s284_s2, 4  ;;  %s196_s3 = int_to_ptr.vmem [resolvable:$true] %s195_s3 }
   0xa   :  { %s258_s9 = scalar_lea.vmem %s196_s3, 256  ;;  %p263_p1 = scmp.lt.s32.totalorder %s196_s3, %s196_s3 }
   0xb   :  { %p259_p0 = scmp.ne.s32.totalorder %s196_s3, %s258_s9  ;;  %p264_p2 = scmp.lt.s32.totalorder %s258_s9, %s258_s9 }
   0xc   :  { %238 = vmatpush3.bf16.msra.mxu1 %v255_v6 }
   0xd   :  { %239 = vmatprep.subr.bf16.mxu1 %v282_v1  ;;  %p265_p3 = por %p264_p2, %p263_p1 }
   0xf   :  { %p266_p4 = pnand %p265_p3, %p259_p0 }
  0x10   :  { %240 = vmatpush3.bf16.msra.mxu1 %v256_v7 }
  0xdc   :  { %v90_v9 = vpop.f32.mrb[0].mxu0 }
  0xdd   :  { %v91_v10 = vadd.f32 %v206_v8, %v90_v9  ;;  %v231_v11 = vpop.f32.mrb[1].mxu0 }
  0xde   :  { %v93_v12 = vpop.f32.mrb[2].mxu0 }
  0xdf   :  { %v94_v13 = vadd.f32 %v206_v8, %v93_v12  ;;  %v232_v14 = vpop.f32.mrb[3].mxu0  ;;  %v97_v15 = vmax.f32 %v91_v10, 0.0 }
  0xe1   :  { %v98_v16 = vmax.f32 %v94_v13, 0.0 }
  0xe3   :  { %v99_v17 = vpack.c.bf16 %v98_v16, %v97_v15 }
  0xe5   :  { %242 = vmatmul.mubr.msk.bf16.vlgmr.msra.gmra.mrb[0].mxu1 %vm139_vm2, %v99_v17 }
 0x1b8   :  { %v177_v20 = vpop.f32.mrb[0].mxu1 }
 0x1b9   :  { %v178_v21 = vadd.f32 %v211_v18, %v177_v20  ;;  %v243_v22 = vpop.f32.mrb[1].mxu1 }
 0x1ba   :  { %v180_v24 = vpop.f32.mrb[2].mxu1 }
 0x1bb   :  { %v186_v25 = vadd.f32 %v184_v19, %v178_v21  ;;  %v181_v26 = vadd.f32 %v211_v18, %v180_v24  ;;  %v244_v27 = vpop.f32.mrb[3].mxu1 }
 0x1bd   :  { %188 = vst.msk [vmem:[#allocation2] sm:$0xff] %vm52_vm1, %v186_v25  ;;  %v187_v28 = vadd.f32 %v185_v23, %v181_v26 }
 0x1bf   :  { %189 = vst.msk [vmem:[#allocation2 + $0x8] sm:$0xff] %vm52_vm1, %v187_v28 }
 0x1c0   :  { %269 = shalt.err (!%p266_p4)
}
 0x1c1   :  { %s270_s11 = scalar_lea.hbm %s364_s5, 256 }
 0x1c2   :  { %p271_p5 = scmp.ne.s32.totalorder %s364_s5, %s270_s11  ;;  %p274_p6 = scmp.lt.u32.totalorder %s270_s11, %s364_s5 }
 0x1c4   :  { %p276_p7 = pnand %p274_p6, %p271_p5 }
 0x1c6   :  { %279 = shalt.err (!%p276_p7)
}
 0x1c7   :  { %s285_s16 = smov 128   ;;  %s286_s17 = smov 8  }
 0x1c8   :  { %201 = dma.vmem_to_hbm [thread:$0]  %s196_s3, 256, %s364_s5, [#allocation3], %s285_s16, %s285_s16, %s286_s17  }
 0x1c9   :  { %280 = dma.done.wait [#allocation3], 256  }
 0x1ca   :  { %281 = vsyncadd [#allocation3], 4294967040 }
 0x1cb   :  { %205 = vsyncpa [#allocation3], 1 }

// kernel: _lambda_.10
= control target key start
LH: loop header
LB: loop body
LE: loop exit
PB: predicated region body
PF: predicated region fallthrough
CT: control target
= control target key end

     0   :  { %s961_s18 = smov 0   ;;  %s963_s19 = smov 0   ;;  %s1073_s0 = inlined_call_operand.vmem [shape: bf16[2,8,32], index: 0, kind: input, shape index: {}]   ;;  %s1074_s1 = inlined_call_operand.vmem [shape: bf16[2,64,32], index: 1, kind: input, shape index: {}]   ;;  %s1075_s2 = inlined_call_operand.vmem [shape: bf16[32,32], index: 2, kind: input, shape index: {}]   ;;  %s1076_s3 = inlined_call_operand.vmem [shape: bf16[32,64], index: 3, kind: input, shape index: {}]   ;;  %s1077_s4 = inlined_call_operand.vmem [shape: bf16[32,32], index: 4, kind: input, shape index: {}]   ;;  %s1078_s5 = inlined_call_operand.vmem [shape: bf16[2,8,32], index: 5, kind: output, shape index: {}]  }
   0x1   :  { %s965_s20 = smov 0  }
   0x2 LB: > { %s27_s21 = sadd.s32 1, %s922_s19  ;;  %p763_p0 = scmp.ge.s32.totalorder %s926_s20, 1  ;;  %s926_s20 = sphi %s965_s20, %s15_s20   ;;  %s922_s19 = sphi %s963_s19, %s1080_s19   ;;  %s918_s18 = sphi %s961_s18, %s1079_s18  }
   0x3   : > { %p29_p1 = scmp.ge.s32.totalorder %s27_s21, 2  ;;  %p215_p2 = scmp.lt.s32.totalorder %s926_s20, 3 }
   0x5   : > { %s1082_s21 = smov (%p29_p1, %s27_s21), 0  ;;  %p216_p3 = pnand %p763_p0, %p215_p2 }
   0x6   : > { %v890_v0 = vld [vmem:[%s1076_s3] sm:$0xff] (!%p216_p3)   ;;  %p252_p4 = scmp.lt.s32.totalorder (!%p216_p3), %s918_s18, 1  ;;  %v891_v1 = vld [vmem:[%s1076_s3 + $0x8] sm:$0xff] (!%p216_p3)   ;;  %v928_v2 = vmov (!%p216_p3), 0.0   ;;  %vm320_vm0 = vcmask (!%p216_p3), 261120   ;;  %vm929_vm1 = vmmov (!%p216_p3), 0  }
   0x7   : > { %219 = sbr.rel (%p216_p3) target bundleno = 1235 (0x4d3), region = 40  ;;  %811 = vmatprep.subr.bf16.mxu0 (!%p216_p3), %v890_v0  ;;  %823 = vmatprep.subr.bf16.mxu1 (!%p216_p3), %v928_v2  ;;  %v896_v3 = vld [vmem:[%s1075_s2] sm:$0xff] (!%p216_p3)   ;;  %v897_v4 = vld [vmem:[%s1075_s2 + $0x8] sm:$0xff] (!%p216_p3)   ;;  %vm398_vm2 = vcmask (!%p216_p3), 523264   ;;  %s930_s13 = smov (!%p216_p3), 96   ;;  %vm671_vm3 = vcmask (!%p216_p3), 257024  }
   0x8   : > { %812 = vmatpush3.bf16.msra.mxu0 (!%p216_p3), %v890_v0  ;;  %827 = vmatprep.mubr.msk.bf16.mxu1 (!%p216_p3), %vm929_vm1, %v928_v2  ;;  %v898_v56 = vld [vmem:[%s1077_s4] sm:$0xff] (!%p216_p3)   ;;  %v899_v58 = vld [vmem:[%s1077_s4 + $0x8] sm:$0xff] (!%p216_p3)  }
   0x9   : > { %813 = vmatprep.subr.bf16.mxu0 (!%p216_p3), %v891_v1  ;;  %824 = vmatpush3.bf16.msra.mxu1 (!%p216_p3), %v896_v3 }
   0xa   : > { %825 = vmatprep.subr.bf16.mxu1 (!%p216_p3), %v928_v2 }
   0xc   : > { %814 = vmatpush3.bf16.msra.mxu0 (!%p216_p3), %v891_v1 }
   0xd   : > { %831 = vmatprep.subr.bf16.mxu0 (!%p216_p3), %v928_v2  ;;  %826 = vmatpush3.bf16.msra.mxu1 (!%p216_p3), %v897_v4 }
   0xe   : > { %s1084_s18 = smov (!%p252_p4, %s918_s18), 1  ;;  %843 = vmatprep.subr.bf16.mxu1 %v928_v2 }
   0xf   : > { %s788_s28 = sshll.u32 %s1084_s18, 5  ;;  %s764_s6 = sshll.u32 %s1084_s18, 2 }
  0x10   : > { %s263_s9 = scalar_lea.vmem %s1074_s1, %s788_s28  ;;  %s258_s12 = scalar_lea.vmem %s1073_s0, %s764_s6 }
  0x11   : > { %v892_v5 = vld [vmem:[%s263_s9] sm:$0xff]   ;;  %v893_v6 = vld [vmem:[%s263_s9 + $0x8] sm:$0xff]   ;;  %v894_v7 = vld [vmem:[%s263_s9 + $0x10] sm:$0xff]   ;;  %s270_s24 = scalar_lea.vmem %s1078_s5, %s764_s6 }
  0x12   : > { %815 = vmatprep.mubr.msk.bf16.mxu0 %vm320_vm0, %v892_v5  ;;  %v1010_v8 = vld [vmem:[%s258_s12] sm:$0xf]  ;;  %v895_v9 = vld [vmem:[%s263_s9 + $0x18] sm:$0xff]  }
  0x13   : > { %816 = vmatmul.mubr.msk.bf16.vlgmr.msra.gmra.mrb[0].mxu0 %vm320_vm0, %v893_v6  ;;  %828 = vmatmul.mubr.msk.bf16.vlgmr.msra.gmra.mrb[0].mxu1 %vm320_vm0, %v1010_v8  ;;  %v668_v0 = vunpack.c.l.bf16 %v1010_v8 }
  0x14   : > { %819 = vmatprep.mubr.msk.bf16.mxu0 %vm320_vm0, %v894_v7  ;;  %851 = vmatprep.mubr.msk.bf16.mxu1 %vm929_vm1, %v928_v2 }
  0x1b   : > { %820 = vmatmul.mubr.msk.bf16.gmra.mrb[4].mxu0 %vm320_vm0, %v895_v9 }
  0x1c   : > { %839 = vmatprep.mubr.msk.bf16.mxu0 %vm929_vm1, %v928_v2 }
  0xe6   : > { %v817_v10 = vpop.f32.mrb[0].mxu0  ;;  %v462_v13 = vpop.f32.mrb[0].mxu1 }
  0xe7   : > { %401 = vst.msk [vmem:[#allocation2 + $0x10] sm:$0xff] %vm398_vm2, %v817_v10  ;;  %v367_v11 = vpop.f32.mrb[1].mxu0  ;;  %v829_v15 = vpop.f32.mrb[1].mxu1  ;;  %v476_v38 = vpack.c.bf16 %v462_v13, %v462_v13 }
  0xe8   : > { %399 = vst.msk [vmem:[#allocation2] sm:$0xff] %vm398_vm2, %v367_v11  ;;  %v818_v12 = vpop.f32.mrb[2].mxu0  ;;  %v465_v16 = vpop.f32.mrb[2].mxu1 }
  0xe9   : > { %402 = vst.msk [vmem:[#allocation2 + $0x18] sm:$0xff] %vm398_vm2, %v818_v12  ;;  %v370_v14 = vpop.f32.mrb[3].mxu0  ;;  %v830_v17 = vpop.f32.mrb[3].mxu1 }
  0xea   : > { %400 = vst.msk [vmem:[#allocation2 + $0x8] sm:$0xff] %vm398_vm2, %v370_v14 }
  0xee   : > { %v821_v18 = vpop.f32.mrb[4].mxu0  ;;  %v470_v27 = vld [vmem:[#allocation2 + $0x10] sm:$0xff] }
  0xef   : > { %405 = vst.msk [vmem:[#allocation2 + $0x30] sm:$0xff] %vm398_vm2, %v821_v18  ;;  %v383_v19 = vpop.f32.mrb[5].mxu0  ;;  %v468_v21 = vld [vmem:[#allocation2] sm:$0xff] }
  0xf0   : > { %403 = vst.msk [vmem:[#allocation2 + $0x20] sm:$0xff] %vm398_vm2, %v383_v19  ;;  %v822_v20 = vpop.f32.mrb[6].mxu0  ;;  %v471_v25 = vld [vmem:[#allocation2 + $0x18] sm:$0xff] }
  0xf1   : > { %v469_v22 = vld [vmem:[#allocation2 + $0x8] sm:$0xff]  ;;  %406 = vst.msk [vmem:[#allocation2 + $0x38] sm:$0xff] %vm398_vm2, %v822_v20  ;;  %v386_v23 = vpop.f32.mrb[7].mxu0  ;;  %v478_v28 = vpack.c.bf16 %v471_v25, %v470_v27 }
  0xf2   : > { %v477_v24 = vpack.c.bf16 %v469_v22, %v468_v21  ;;  %404 = vst.msk [vmem:[#allocation2 + $0x28] sm:$0xff] %vm398_vm2, %v386_v23 }
  0xf3   : > { %v488_v32 = vsel %vm320_vm0, %v478_v28, 0 }
  0xf4   : > { %553 = vrot.lane.b32.xlu1 %v477_v24, %s930_s13  ;;  %v485_v26 = vsel %vm320_vm0, %v477_v24, 0 }
  0xf5   : > { %832 = vmatpush3.bf16.xpose.msra.mxu0 %v485_v26 }
  0xf6   : > { %833 = vmatprep.subr.bf16.mxu0 %v928_v2  ;;  %v474_v29 = vld [vmem:[#allocation2 + $0x30] sm:$0xff] }
  0xf7   : > { %v472_v33 = vld [vmem:[#allocation2 + $0x20] sm:$0xff] }
  0xf8   : > { %555 = vrot.lane.b32.xlu1 %v478_v28, %s930_s13  ;;  %v475_v30 = vld [vmem:[#allocation2 + $0x38] sm:$0xff] }
  0xf9   : > { %v480_v31 = vpack.c.bf16 %v475_v30, %v474_v29  ;;  %v473_v34 = vld [vmem:[#allocation2 + $0x28] sm:$0xff] }
  0xfa   : > { %v479_v35 = vpack.c.bf16 %v473_v34, %v472_v33 }
  0xfb   : > { %v494_v37 = vsel %vm320_vm0, %v480_v31, 0 }
  0xfc   : > { %559 = vrot.lane.b32.xlu1 %v480_v31, %s930_s13  ;;  %v491_v36 = vsel %vm320_vm0, %v479_v35, 0 }
  0xfd   : > { %834 = vmatpush3.bf16.xpose.msra.mxu0 %v488_v32 }
  0xfe   : > { %835 = vmatprep.subr.bf16.mxu0 %v928_v2 }
 0x105   : > { %836 = vmatpush3.bf16.xpose.msra.mxu0 %v491_v36 }
 0x106   : > { %837 = vmatprep.subr.bf16.mxu0 %v928_v2 }
 0x10d   : > { %838 = vmatpush3.bf16.xpose.msra.mxu0 %v494_v37 }
 0x114   : > { %840 = vmatmul.mubr.msk.bf16.vlgmr.msra.gmra.mrb[8].mxu0 %vm320_vm0, %v476_v38 }
 0x166   : > { %v554_v39 = vpop.permute.xlu1 %553 }
 0x167   : > { %844 = vmatpush3.bf16.msra.mxu1 %v554_v39 }
 0x168   : > { %845 = vmatprep.subr.bf16.mxu1 %v928_v2 }
 0x16a   : > { %v556_v40 = vpop.permute.xlu1 %555 }
 0x16b   : > { %846 = vmatpush3.bf16.msra.mxu1 %v556_v40 }
 0x16c   : > { %847 = vmatprep.subr.bf16.mxu1 %v928_v2 }
 0x16e   : > { %v560_v53 = vpop.permute.xlu1 %559 }
 0x1e7   : > { %v530_v41 = vpop.f32.mrb[8].mxu0 }
 0x1e8   : > { %v841_v42 = vpop.f32.mrb[9].mxu0  ;;  %v537_v43 = vsel %vm398_vm2, %v530_v41, -inf }
 0x1e9   : > { %538 = vmax.xlane.f32.xlu0 %v537_v43  ;;  %v533_v44 = vpop.f32.mrb[10].mxu0 }
 0x1ea   : > { %v842_v45 = vpop.f32.mrb[11].mxu0 }
 0x276   : > { %v539_v46 = vpop.xlane.xlu0 %538 }
 0x277   : > { %v540_v47 = vsub.f32 %v530_v41, %v539_v46 }
 0x279   : > { %v541_v48 = vmul.f32 1.442695, %v540_v47 }
 0x27b   : > { %900 = vpow2.f32 %v541_v48 }
 0x285   : > { %v901_v49 = vpop.eup %900 }
 0x286   : > { %v543_v50 = vsel %vm398_vm2, %v901_v49, 0.0 }
 0x287   : > { %544 = vadd.xlane.f32.xlu0 %v543_v50 }
 0x29d   : > { %557 = vrot.lane.b32.xlu0 %v479_v35, %s930_s13 }
 0x314   : > { %v545_v51 = vpop.xlane.xlu0 %544 }
 0x315   : > { %902 = vrcp.f32 %v545_v51 }
 0x318   : > { %v558_v52 = vpop.permute.xlu0 %557 }
 0x319   : > { %848 = vmatpush3.bf16.msra.mxu1 %v558_v52 }
 0x31a   : > { %849 = vmatprep.subr.bf16.mxu1 %v928_v2 }
 0x31d   : > { %850 = vmatpush3.bf16.msra.mxu1 %v560_v53 }
 0x31e   : > { %855 = vmatprep.subr.bf16.mxu1 %v928_v2 }
 0x31f   : > { %v903_v54 = vpop.eup %902 }
 0x320   : > { %v547_v55 = vmul.f32 %v903_v54, %v901_v49 }
 0x322   : > { %v548_v57 = vpack.c.bf16 %v547_v55, %v547_v55 }
 0x324   : > { %852 = vmatmul.mubr.msk.bf16.vlgmr.msra.gmra.mrb[4].mxu1 %vm398_vm2, %v548_v57 }
 0x325   : > { %856 = vmatpush3.bf16.msra.mxu1 %v898_v56  ;;  %859 = vmatprep.mubr.msk.bf16.mxu1 %vm929_vm1, %v928_v2 }
 0x326   : > { %857 = vmatprep.subr.bf16.mxu1 %v928_v2 }
 0x329   : > { %858 = vmatpush3.bf16.msra.mxu1 %v899_v58 }
 0x3f7   : > { %v602_v59 = vpop.f32.mrb[4].mxu1 }
 0x3f8   : > { %v608_v60 = vpack.c.bf16 %v602_v59, %v602_v59  ;;  %v853_v61 = vpop.f32.mrb[5].mxu1 }
 0x3f9   : > { %v605_v62 = vpop.f32.mrb[6].mxu1 }
 0x3fa   : > { %v854_v63 = vpop.f32.mrb[7].mxu1  ;;  %860 = vmatmul.mubr.msk.bf16.vlgmr.msra.gmra.mrb[8].mxu1 %vm320_vm0, %v608_v60 }
 0x4cd   : > { %v662_v1 = vpop.f32.mrb[8].mxu1 }
 0x4ce   : > { %v669_v3 = vadd.f32 %v668_v0, %v662_v1  ;;  %v861_v4 = vpop.f32.mrb[9].mxu1 }
 0x4cf   : > { %v665_v2 = vpop.f32.mrb[10].mxu1 }
 0x4d0   : > { %v670_v5 = vpack.c.bf16 %v669_v3, %v669_v3  ;;  %v862_v6 = vpop.f32.mrb[11].mxu1 }
 0x4d2   : > { %672 = vst.msk [vmem:[%s270_s24] sm:$0xf] %vm671_vm3, %v670_v5 }
 0x4d3 PF: > { %s15_s20 = sadd.s32 1, %s926_s20   ;;  %s1079_s18 = smov %s922_s19 }
 0x4d4   : > { %p12_p5 = scmp.ge.s32.totalorder %s15_s20, 4   ;;  %s1080_s19 = smov %s1082_s21 }
 0x4d6   :  { %14 = sbr.rel (!%p12_p5) target bundleno = 2 (0x2), region = 77 }

</bundles_post_ra>
